<compile_context>
chip_gen: v7x
topology: tpu7x:2x2x1
jax: 0.10.0
libtpu: 0.0.40
codegen_flags: <defaults>
</compile_context>

<pallas_src>
import functools
import math

import jax
import jax.numpy as jnp
import numpy as np
from jax import lax
from jax.experimental import pallas as pl
from jax.experimental.pallas import tpu as pltpu

EPS = 1e-5
DEFAULT_TILE_T = 512            # output time rows per grid step
VMEM_LIMIT = 32 * 1024 * 1024   # scoped-VMEM budget (safe on v5e/v6e/v7x)


# ---------------------------------------------------------------------------
# Fused SpeechBasicBlock kernel (optionally with the frontend conv fused in).
#
#   prologue (j==0): fill padded-input scratch xpad (copy or frontend matmul),
#                    zeroing only the head/tail halo rows.
#   per tile:        conv1(+downsample, one fused MXU matmul) + BN + ReLU
#                    -> mask invalid h rows -> conv2 + BN + residual + ReLU.
# ---------------------------------------------------------------------------
def _block_kernel(*refs, width, stride, pad, t_mid, tile_t, T_in,
                  has_downsample, has_frontend, head, xpad_rows):
    idx = 0
    x_ref = refs[idx]; idx += 1
    if has_frontend:
        wf_ref, sf_ref, bf_ref = refs[idx:idx + 3]; idx += 3
    w1_ref, s1_ref, b1_ref, w2_ref, s2_ref, b2_ref = refs[idx:idx + 6]; idx += 6
    if has_downsample:
        sd_ref, bd_ref = refs[idx:idx + 2]; idx += 2
    out_ref = refs[idx]; idx += 1
    xpad = refs[idx]

    planes = s1_ref.shape[-1]
    j = pl.program_id(1)

    # ---- prologue: fill the per-batch padded-input scratch (copy only) ----
    @pl.when(j == 0)
    def _prologue():
        cpad = xpad.shape[-1]
        tail0 = head + T_in
        # halo-only zeroing (head rows + tail rows needed by the last tile)
        if head > 0:
            xpad[0:head, :] = jnp.zeros((head, cpad), xpad.dtype)
        if xpad_rows > tail0:
            xpad[tail0:xpad_rows, :] = jnp.zeros((xpad_rows - tail0, cpad),
                                                 xpad.dtype)
        if has_frontend:
            # frontend (feat_dim x 1) conv == per-frame matmul + BN + ReLU
            y0 = jnp.dot(x_ref[0], wf_ref[...],
                         preferred_element_type=jnp.float32)
            y0 = jnp.maximum(y0 * sf_ref[...] + bf_ref[...], 0.0)
            xpad[head:tail0, :] = y0.astype(xpad.dtype)
        else:
            xpad[head:tail0, :] = x_ref[0].astype(xpad.dtype)

    # ---- per output-time tile ----
    r0 = j * tile_t
    if tile_t % 8 == 0:
        r0 = pl.multiple_of(r0, 8)
    ttp = tile_t + 2 * pad          # conv1 rows needed (conv2 halo included)

    # conv1 (+ fused downsample) im2col: tap k of local h-row u reads
    # xpad[stride*r0 + stride*u + k].
    cols = []
    for k in range(width):
        if stride == 1:
            c = xpad[pl.ds(r0 + k, ttp), :]
        else:
            c = xpad[pl.ds(stride * r0 + k, ttp, stride=stride), :]
        cols.append(c.astype(jnp.bfloat16))
    im2col1 = jnp.concatenate(cols, axis=-1)
    y = jnp.dot(im2col1, w1_ref[...], preferred_element_type=jnp.float32)

    # conv1 BN + ReLU, then zero rows outside the valid conv1 output range
    # (these rows are conv2's zero padding — required for correctness).
    h = jnp.maximum(y[:, :planes] * s1_ref[...] + b1_ref[...], 0.0)
    t_h = (r0 - pad) + lax.broadcasted_iota(jnp.int32, (ttp, 1), 0)
    h = jnp.where((t_h >= 0) & (t_h < t_mid), h, 0.0)
    h_b = h.astype(jnp.bfloat16)

    # conv2 (stride 1): im2col over the tile-local h.
    cols2 = [h_b[k:k + tile_t, :] for k in range(width)]
    im2col2 = jnp.concatenate(cols2, axis=-1)
    o = jnp.dot(im2col2, w2_ref[...], preferred_element_type=jnp.float32)
    o = o * s2_ref[...] + b2_ref[...]

    if has_downsample:
        # downsample result = second half of the fused conv1 matmul, tap `pad`
        res = y[pad:pad + tile_t, planes:] * sd_ref[...] + bd_ref[...]
    else:
        # identity residual (stride == 1, Cin == planes, asserted in wrapper)
        res = xpad[pl.ds(head + r0, tile_t), :].astype(jnp.float32)

    out_ref[0] = jnp.maximum(o + res, 0.0).astype(out_ref.dtype)


def speech_block(x, blk, *, width, pad, tile_t=DEFAULT_TILE_T, frontend=None):
    """Fused SpeechBasicBlock. x: (B, T, Cin) bf16 -> (B, t_out, planes) bf16.

    If `frontend=(wf, scale, shift)` is given, x holds raw features
    (B, T, feat_dim) and the frontend conv+BN+ReLU is fused into this block.
    """
    B, T_in, c_in_arr = x.shape
    stride = blk["stride"]
    has_frontend = frontend is not None
    if has_frontend:
        wf, sf_, bf_ = frontend
        c_in = wf.shape[1]           # conv1 input channels = frontend output
    else:
        c_in = c_in_arr
    planes = blk["w1"].shape[-1]
    t_out = (T_in + 2 * pad - width) // stride + 1
    has_ds = "wd" in blk
    if not has_ds:
        assert stride == 1 and c_in == planes, \
            "identity residual requires stride==1 and Cin==planes"

    TT = t_out if t_out <= tile_t else (tile_t // 8) * 8
    NT = pl.cdiv(t_out, TT)
    head = (stride + 1) * pad            # zero rows before x[0] in xpad coords
    Sx = max(stride * (NT * TT + 2 * pad - 1) + 2 * pad + 1, head + T_in)
    Sx = ((Sx + 7) // 8) * 8
    # bf16 scratch for contiguous (stride-1) tap reads; keep f32 for the
    # stride-2 strided reads (proven lowering path, small buffer anyway).
    xdtype = jnp.bfloat16 if stride == 1 else jnp.float32

    # im2col weight layout: row k*Cin + ci, col co == torch_w[co, ci, 0, k].
    # Downsample 1x1 conv fused as extra output columns, nonzero only in the
    # tap-`pad` rows -> one MXU matmul produces both h and the residual.
    w1 = blk["w1"].reshape(width * c_in, planes)
    if has_ds:
        wd = blk["wd"].reshape(c_in, planes)
        wfull = jnp.zeros((width * c_in, 2 * planes), jnp.float32)
        wfull = wfull.at[:, :planes].set(w1)
        wfull = wfull.at[pad * c_in:(pad + 1) * c_in, planes:].set(wd)
        w1 = wfull
    w1 = w1.astype(jnp.bfloat16)
    n_w1 = w1.shape[1]
    w2 = blk["w2"].reshape(width * planes, planes).astype(jnp.bfloat16)

    def _affine(v):
        return v.reshape(1, -1).astype(jnp.float32)

    s1, b1 = _affine(blk["bn1"][0]), _affine(blk["bn1"][1])
    s2, b2 = _affine(blk["bn2"][0]), _affine(blk["bn2"][1])

    in_specs = [pl.BlockSpec((1, T_in, c_in_arr), lambda b, j: (b, 0, 0))]
    args = [x]
    if has_frontend:
        F = wf.shape[0]
        in_specs += [pl.BlockSpec((F, c_in), lambda b, j: (0, 0)),
                     pl.BlockSpec((1, c_in), lambda b, j: (0, 0)),
                     pl.BlockSpec((1, c_in), lambda b, j: (0, 0))]
        args += [wf.astype(jnp.bfloat16), _affine(sf_), _affine(bf_)]
    in_specs += [
        pl.BlockSpec((width * c_in, n_w1), lambda b, j: (0, 0)),
        pl.BlockSpec((1, planes), lambda b, j: (0, 0)),
        pl.BlockSpec((1, planes), lambda b, j: (0, 0)),
        pl.BlockSpec((width * planes, planes), lambda b, j: (0, 0)),
        pl.BlockSpec((1, planes), lambda b, j: (0, 0)),
        pl.BlockSpec((1, planes), lambda b, j: (0, 0)),
    ]
    args += [w1, s1, b1, w2, s2, b2]
    if has_ds:
        sd, bd = _affine(blk["bnd"][0]), _affine(blk["bnd"][1])
        in_specs += [pl.BlockSpec((1, planes), lambda b, j: (0, 0)),
                     pl.BlockSpec((1, planes), lambda b, j: (0, 0))]
        args += [sd, bd]

    kernel = functools.partial(
        _block_kernel, width=width, stride=stride, pad=pad, t_mid=t_out,
        tile_t=TT, T_in=T_in, has_downsample=has_ds, has_frontend=has_frontend,
        head=head, xpad_rows=Sx)

    flops = (2 * B * (t_out + 2 * pad) * width * c_in * n_w1
             + 2 * B * t_out * width * planes * planes)
    if has_frontend:
        flops += 2 * B * T_in * wf.shape[0] * c_in
    bytes_acc = int(x.size * x.dtype.itemsize + (w1.size + w2.size) * 2
                    + B * t_out * planes * 2)

    return pl.pallas_call(
        kernel,
        out_shape=jax.ShapeDtypeStruct((B, t_out, planes), jnp.bfloat16),
        grid=(B, NT),
        in_specs=in_specs,
        out_specs=pl.BlockSpec((1, TT, planes), lambda b, j: (b, j, 0)),
        scratch_shapes=[pltpu.VMEM((Sx, c_in), xdtype)],
        compiler_params=pltpu.CompilerParams(
            dimension_semantics=("parallel", "arbitrary"),
            vmem_limit_bytes=VMEM_LIMIT),
        cost_estimate=pl.CostEstimate(flops=int(flops), transcendentals=0,
                                      bytes_accessed=bytes_acc),
    )(*args)


# ---------------------------------------------------------------------------
# Parameter construction (matches the PyTorch module __init__)
# ---------------------------------------------------------------------------
def bn_affine(c):
    gamma = jnp.ones((c,), jnp.float32)
    beta = jnp.zeros((c,), jnp.float32)
    running_mean = jnp.zeros((c,), jnp.float32)
    running_var = jnp.ones((c,), jnp.float32)
    scale = gamma / jnp.sqrt(running_var + EPS)
    shift = beta - running_mean * scale
    return scale, shift


def init_params(key, feat_dim, layer_widths, layers, convsize):
    keys = iter(jax.random.split(key, 128))
    params = {}
    c0 = layer_widths[0]

    # frontend Conv2d(1, c0, kernel=(feat_dim, 1)); n = feat_dim * 1 * c0
    std = math.sqrt(2.0 / (feat_dim * 1 * c0))
    params["frontend_w"] = std * jax.random.normal(
        next(keys), (feat_dim, c0), jnp.float32)
    params["frontend_bn"] = bn_affine(c0)

    inplanes = c0
    blocks = []
    layer_strides = [2] * len(layers)   # amd=False default
    for planes, nblocks, layer_stride in zip(layer_widths[1:], layers, layer_strides):
        for bi in range(nblocks):
            s = layer_stride if bi == 0 else 1
            blk = {"stride": s}
            std_c = math.sqrt(2.0 / (1 * convsize * planes))
            blk["w1"] = std_c * jax.random.normal(
                next(keys), (convsize, inplanes, planes), jnp.float32)
            blk["bn1"] = bn_affine(planes)
            blk["w2"] = std_c * jax.random.normal(
                next(keys), (convsize, planes, planes), jnp.float32)
            blk["bn2"] = bn_affine(planes)
            if s != 1 or inplanes != planes:
                std_d = math.sqrt(2.0 / (1 * 1 * planes))
                blk["wd"] = std_d * jax.random.normal(
                    next(keys), (1, inplanes, planes), jnp.float32)
                blk["bnd"] = bn_affine(planes)
            blocks.append(blk)
            inplanes = planes
    params["blocks"] = blocks
    return params


# ---------------------------------------------------------------------------
# ResDavenet forward (Pallas) and a matching pure-JAX reference
# ---------------------------------------------------------------------------
def resdavenet_forward_pallas(x_nchw, params, convsize, *, tile_t=DEFAULT_TILE_T):
    assert convsize % 2 == 1, "amd=False path requires odd convsize"
    pad = (convsize - 1) // 2
    # (B, 1, feat_dim, T) -> (B, T, feat_dim); activations stay bf16 between blocks
    x = jnp.transpose(x_nchw[:, 0], (0, 2, 1)).astype(jnp.bfloat16)
    sf_, bf_ = params["frontend_bn"]
    blocks = params["blocks"]
    # frontend conv fused into block 1's prologue (no separate HBM round trip)
    x = speech_block(x, blocks[0], width=convsize, pad=pad, tile_t=tile_t,
                     frontend=(params["frontend_w"], sf_, bf_))
    for blk in blocks[1:]:
        x = speech_block(x, blk, width=convsize, pad=pad, tile_t=tile_t)
    # torch: x.squeeze(2) -> (B, C, T)
    return jnp.transpose(x.astype(jnp.float32), (0, 2, 1))


def _conv1d_bn_ref(x_bf16, w_f32, scale, shift, *, stride, pad, relu):
    y = lax.conv_general_dilated(
        x_bf16, w_f32.astype(jnp.bfloat16),
        window_strides=(stride,), padding=[(pad, pad)],
        dimension_numbers=("NWC", "WIO", "NWC"),
        preferred_element_type=jnp.float32)
    y = y * scale[None, None, :] + shift[None, None, :]
    if relu:
        y = jnp.maximum(y, 0.0)
    return y


def resdavenet_forward_ref(x_nchw, params, convsize):
    pad = (convsize - 1) // 2
    x = jnp.transpose(x_nchw[:, 0], (0, 2, 1)).astype(jnp.bfloat16)
    sf_, bf_ = params["frontend_bn"]
    wf = params["frontend_w"].astype(jnp.bfloat16)
    y = lax.dot_general(x, wf, (((2,), (0,)), ((), ())),
                        preferred_element_type=jnp.float32)
    y = jnp.maximum(y * sf_[None, None, :] + bf_[None, None, :], 0.0)
    x = y.astype(jnp.bfloat16)
    for blk in params["blocks"]:
        st = blk["stride"]
        s1, b1 = blk["bn1"]
        s2, b2 = blk["bn2"]
        h = _conv1d_bn_ref(x, blk["w1"], s1, b1, stride=st, pad=pad, relu=True)
        h = h.astype(jnp.bfloat16)
        o = _conv1d_bn_ref(h, blk["w2"], s2, b2, stride=1, pad=pad, relu=False)
        if "wd" in blk:
            sd, bd = blk["bnd"]
            r = _conv1d_bn_ref(x, blk["wd"], sd, bd, stride=st, pad=0, relu=False)
        else:
            r = x.astype(jnp.float32)
        x = jnp.maximum(o + r, 0.0).astype(jnp.bfloat16)
    return jnp.transpose(x.astype(jnp.float32), (0, 2, 1))


if __name__ == "__main__":
    key = jax.random.PRNGKey(0)
    kx, kp = jax.random.split(key)

    # small, module-consistent config (128-wide channels -> lane-dense layout)
    B, feat_dim, T = 2, 40, 96
    convsize = 9
    layer_widths = [128, 128, 128, 128, 128]
    layers = [2, 2, 2, 2]

    x = jax.random.normal(kx, (B, 1, feat_dim, T), jnp.float32)
    params = init_params(kp, feat_dim, layer_widths, layers, convsize)

    ref = resdavenet_forward_ref(x, params, convsize)

    # 1) default tiling (single time tile per block at this size)
    out = jax.block_until_ready(resdavenet_forward_pallas(x, params, convsize))
    assert out.shape == (B, layer_widths[-1], T // 16), out.shape
    np.testing.assert_allclose(np.asarray(out), np.asarray(ref),
                               rtol=2e-2, atol=2e-2)

    # 2) small tiles: exercises multi-tile pipelining, the per-batch prologue
    #    reuse, halo masking and a ragged (partially OOB) last tile.
    out2 = jax.block_until_ready(
        resdavenet_forward_pallas(x, params, convsize, tile_t=16))
    np.testing.assert_allclose(np.asarray(out2), np.asarray(ref),
                               rtol=2e-2, atol=2e-2)

    print("KERNEL_OK")
</pallas_src>

<mosaic_0001>
module attributes {stable_mosaic.version = 11 : i64} {
  func.func @_block_kernel(%arg0: i32, %arg1: i32, %arg2: memref<1x96x40xbf16, #tpu.memory_space<vmem>>, %arg3: memref<40x128xbf16, #tpu.memory_space<vmem>>, %arg4: memref<1x128xf32, #tpu.memory_space<vmem>>, %arg5: memref<1x128xf32, #tpu.memory_space<vmem>>, %arg6: memref<1152x256xbf16, #tpu.memory_space<vmem>>, %arg7: memref<1x128xf32, #tpu.memory_space<vmem>>, %arg8: memref<1x128xf32, #tpu.memory_space<vmem>>, %arg9: memref<1152x128xbf16, #tpu.memory_space<vmem>>, %arg10: memref<1x128xf32, #tpu.memory_space<vmem>>, %arg11: memref<1x128xf32, #tpu.memory_space<vmem>>, %arg12: memref<1x128xf32, #tpu.memory_space<vmem>>, %arg13: memref<1x128xf32, #tpu.memory_space<vmem>>, %arg14: memref<1x48x128xbf16, #tpu.memory_space<vmem>>, %arg15: memref<120x128xf32, #tpu.memory_space<vmem>>) attributes {dimension_semantics = [#tpu.dimension_semantics<parallel>, #tpu.dimension_semantics<arbitrary>], iteration_bounds = array<i64: 2, 1>, scalar_prefetch = 0 : i64, scratch_operands = 1 : i64, tpu.core_type = #tpu.core_type<tc>, window_params = [{transform_indices = @transform_0, window_bounds = array<i64: 1, 96, 40>}, {pipeline_mode = #tpu.pipeline_mode<synchronous>, transform_indices = @transform_1, window_bounds = array<i64: 40, 128>}, {pipeline_mode = #tpu.pipeline_mode<synchronous>, transform_indices = @transform_2, window_bounds = array<i64: 1, 128>}, {pipeline_mode = #tpu.pipeline_mode<synchronous>, transform_indices = @transform_3, window_bounds = array<i64: 1, 128>}, {pipeline_mode = #tpu.pipeline_mode<synchronous>, transform_indices = @transform_4, window_bounds = array<i64: 1152, 256>}, {pipeline_mode = #tpu.pipeline_mode<synchronous>, transform_indices = @transform_5, window_bounds = array<i64: 1, 128>}, {pipeline_mode = #tpu.pipeline_mode<synchronous>, transform_indices = @transform_6, window_bounds = array<i64: 1, 128>}, {pipeline_mode = #tpu.pipeline_mode<synchronous>, transform_indices = @transform_7, window_bounds = array<i64: 1152, 128>}, {pipeline_mode = #tpu.pipeline_mode<synchronous>, transform_indices = @transform_8, window_bounds = array<i64: 1, 128>}, {pipeline_mode = #tpu.pipeline_mode<synchronous>, transform_indices = @transform_9, window_bounds = array<i64: 1, 128>}, {pipeline_mode = #tpu.pipeline_mode<synchronous>, transform_indices = @transform_10, window_bounds = array<i64: 1, 128>}, {pipeline_mode = #tpu.pipeline_mode<synchronous>, transform_indices = @transform_11, window_bounds = array<i64: 1, 128>}, {transform_indices = @transform_12, window_bounds = array<i64: 1, 48, 128>}]} {
    %c0_i32 = arith.constant 0 : i32
    %0 = arith.cmpi eq, %arg1, %c0_i32 : i32
    %1 = arith.extui %0 : i1 to i32
    %c0_i32_0 = arith.constant 0 : i32
    %2 = arith.cmpi ne, %1, %c0_i32_0 : i32
    scf.if %2 {
      %cst_45 = arith.constant 0.000000e+00 : f32
      %108 = vector.broadcast %cst_45 : f32 to vector<12x128xf32>
      %c0_46 = arith.constant 0 : index
      %c0_47 = arith.constant 0 : index
      %109 = vector.load %arg15[%c0_46, %c0_47] : memref<120x128xf32, #tpu.memory_space<vmem>>, vector<12x128xf32>
      tpu.vector_store %arg15[%c0_46, %c0_47], %108 {strides = array<i32>} : memref<120x128xf32, #tpu.memory_space<vmem>>, vector<12x128xf32>,
      %cst_48 = arith.constant 0.000000e+00 : f32
      %110 = vector.broadcast %cst_48 : f32 to vector<12x128xf32>
      %c108 = arith.constant 108 : index
      %c0_49 = arith.constant 0 : index
      %111 = vector.load %arg15[%c108, %c0_49] : memref<120x128xf32, #tpu.memory_space<vmem>>, vector<12x128xf32>
      tpu.vector_store %arg15[%c108, %c0_49], %110 {strides = array<i32>} : memref<120x128xf32, #tpu.memory_space<vmem>>, vector<12x128xf32>,
      %c0_50 = arith.constant 0 : index
      %c0_51 = arith.constant 0 : index
      %c0_52 = arith.constant 0 : index
      %112 = vector.load %arg2[%c0_50, %c0_51, %c0_52] : memref<1x96x40xbf16, #tpu.memory_space<vmem>>, vector<1x96x40xbf16>
      %113 = vector.shape_cast %112 : vector<1x96x40xbf16> to vector<96x40xbf16>
      %c0_53 = arith.constant 0 : index
      %c0_54 = arith.constant 0 : index
      %114 = vector.load %arg3[%c0_53, %c0_54] : memref<40x128xbf16, #tpu.memory_space<vmem>>, vector<40x128xbf16>
      %cst_55 = arith.constant dense<0.000000e+00> : vector<96x128xf32>
      %115 = tpu.matmul %113, %114, %cst_55 {dimension_numbers = #tpu.dot_dimension_numbers<[1], [0], [0], [1], [0, 0, 1, 1], [], []>} : vector<96x40xbf16>, vector<40x128xbf16>, vector<96x128xf32> -> vector<96x128xf32>
      %c0_56 = arith.constant 0 : index
      %c0_57 = arith.constant 0 : index
      %116 = vector.load %arg4[%c0_56, %c0_57] : memref<1x128xf32, #tpu.memory_space<vmem>>, vector<1x128xf32>
      %117 = vector.broadcast %116 : vector<1x128xf32> to vector<96x128xf32>
      %118 = arith.mulf %115, %117 : vector<96x128xf32>
      %c0_58 = arith.constant 0 : index
      %c0_59 = arith.constant 0 : index
      %119 = vector.load %arg5[%c0_58, %c0_59] : memref<1x128xf32, #tpu.memory_space<vmem>>, vector<1x128xf32>
      %120 = vector.broadcast %119 : vector<1x128xf32> to vector<96x128xf32>
      %121 = arith.addf %118, %120 : vector<96x128xf32>
      %cst_60 = arith.constant 0.000000e+00 : f32
      %122 = vector.broadcast %cst_60 : f32 to vector<96x128xf32>
      %123 = arith.maximumf %121, %122 : vector<96x128xf32>
      %c12 = arith.constant 12 : index
      %c0_61 = arith.constant 0 : index
      %124 = vector.load %arg15[%c12, %c0_61] : memref<120x128xf32, #tpu.memory_space<vmem>>, vector<96x128xf32>
      tpu.vector_store %arg15[%c12, %c0_61], %123 {strides = array<i32>} : memref<120x128xf32, #tpu.memory_space<vmem>>, vector<96x128xf32>,
    } else {
    }
    %c48_i32 = arith.constant 48 : i32
    %3 = arith.muli %arg1, %c48_i32 : i32
    %4 = tpu.assume_multiple %3, 8 : i32
    %c2_i32 = arith.constant 2 : i32
    %5 = arith.muli %c2_i32, %4 : i32
    %c0_i32_1 = arith.constant 0 : i32
    %6 = arith.addi %5, %c0_i32_1 : i32
    %7 = arith.index_cast %6 : i32 to index
    %c0 = arith.constant 0 : index
    %8 = tpu.strided_load %arg15[%7, %c0] {strides = array<i32: 2, 1>} : memref<120x128xf32, #tpu.memory_space<vmem>>, vector<56x128xf32>
    %9 = arith.truncf %8 : vector<56x128xf32> to vector<56x128xbf16>
    %c2_i32_2 = arith.constant 2 : i32
    %10 = arith.muli %c2_i32_2, %4 : i32
    %c1_i32 = arith.constant 1 : i32
    %11 = arith.addi %10, %c1_i32 : i32
    %12 = arith.index_cast %11 : i32 to index
    %c0_3 = arith.constant 0 : index
    %13 = tpu.strided_load %arg15[%12, %c0_3] {strides = array<i32: 2, 1>} : memref<120x128xf32, #tpu.memory_space<vmem>>, vector<56x128xf32>
    %14 = arith.truncf %13 : vector<56x128xf32> to vector<56x128xbf16>
    %c2_i32_4 = arith.constant 2 : i32
    %15 = arith.muli %c2_i32_4, %4 : i32
    %c2_i32_5 = arith.constant 2 : i32
    %16 = arith.addi %15, %c2_i32_5 : i32
    %17 = arith.index_cast %16 : i32 to index
    %c0_6 = arith.constant 0 : index
    %18 = tpu.strided_load %arg15[%17, %c0_6] {strides = array<i32: 2, 1>} : memref<120x128xf32, #tpu.memory_space<vmem>>, vector<56x128xf32>
    %19 = arith.truncf %18 : vector<56x128xf32> to vector<56x128xbf16>
    %c2_i32_7 = arith.constant 2 : i32
    %20 = arith.muli %c2_i32_7, %4 : i32
    %c3_i32 = arith.constant 3 : i32
    %21 = arith.addi %20, %c3_i32 : i32
    %22 = arith.index_cast %21 : i32 to index
    %c0_8 = arith.constant 0 : index
    %23 = tpu.strided_load %arg15[%22, %c0_8] {strides = array<i32: 2, 1>} : memref<120x128xf32, #tpu.memory_space<vmem>>, vector<56x128xf32>
    %24 = arith.truncf %23 : vector<56x128xf32> to vector<56x128xbf16>
    %c2_i32_9 = arith.constant 2 : i32
    %25 = arith.muli %c2_i32_9, %4 : i32
    %c4_i32 = arith.constant 4 : i32
    %26 = arith.addi %25, %c4_i32 : i32
    %27 = arith.index_cast %26 : i32 to index
    %c0_10 = arith.constant 0 : index
    %28 = tpu.strided_load %arg15[%27, %c0_10] {strides = array<i32: 2, 1>} : memref<120x128xf32, #tpu.memory_space<vmem>>, vector<56x128xf32>
    %29 = arith.truncf %28 : vector<56x128xf32> to vector<56x128xbf16>
    %c2_i32_11 = arith.constant 2 : i32
    %30 = arith.muli %c2_i32_11, %4 : i32
    %c5_i32 = arith.constant 5 : i32
    %31 = arith.addi %30, %c5_i32 : i32
    %32 = arith.index_cast %31 : i32 to index
    %c0_12 = arith.constant 0 : index
    %33 = tpu.strided_load %arg15[%32, %c0_12] {strides = array<i32: 2, 1>} : memref<120x128xf32, #tpu.memory_space<vmem>>, vector<56x128xf32>
    %34 = arith.truncf %33 : vector<56x128xf32> to vector<56x128xbf16>
    %c2_i32_13 = arith.constant 2 : i32
    %35 = arith.muli %c2_i32_13, %4 : i32
    %c6_i32 = arith.constant 6 : i32
    %36 = arith.addi %35, %c6_i32 : i32
    %37 = arith.index_cast %36 : i32 to index
    %c0_14 = arith.constant 0 : index
    %38 = tpu.strided_load %arg15[%37, %c0_14] {strides = array<i32: 2, 1>} : memref<120x128xf32, #tpu.memory_space<vmem>>, vector<56x128xf32>
    %39 = arith.truncf %38 : vector<56x128xf32> to vector<56x128xbf16>
    %c2_i32_15 = arith.constant 2 : i32
    %40 = arith.muli %c2_i32_15, %4 : i32
    %c7_i32 = arith.constant 7 : i32
    %41 = arith.addi %40, %c7_i32 : i32
    %42 = arith.index_cast %41 : i32 to index
    %c0_16 = arith.constant 0 : index
    %43 = tpu.strided_load %arg15[%42, %c0_16] {strides = array<i32: 2, 1>} : memref<120x128xf32, #tpu.memory_space<vmem>>, vector<56x128xf32>
    %44 = arith.truncf %43 : vector<56x128xf32> to vector<56x128xbf16>
    %c2_i32_17 = arith.constant 2 : i32
    %45 = arith.muli %c2_i32_17, %4 : i32
    %c8_i32 = arith.constant 8 : i32
    %46 = arith.addi %45, %c8_i32 : i32
    %47 = arith.index_cast %46 : i32 to index
    %c0_18 = arith.constant 0 : index
    %48 = tpu.strided_load %arg15[%47, %c0_18] {strides = array<i32: 2, 1>} : memref<120x128xf32, #tpu.memory_space<vmem>>, vector<56x128xf32>
    %49 = arith.truncf %48 : vector<56x128xf32> to vector<56x128xbf16>
    %50 = tpu.concatenate %9, %14, %19, %24, %29, %34, %39, %44, %49 in 1 : vector<56x128xbf16>, vector<56x128xbf16>, vector<56x128xbf16>, vector<56x128xbf16>, vector<56x128xbf16>, vector<56x128xbf16>, vector<56x128xbf16>, vector<56x128xbf16>, vector<56x128xbf16> -> vector<56x1152xbf16>
    %c0_19 = arith.constant 0 : index
    %c0_20 = arith.constant 0 : index
    %51 = vector.load %arg6[%c0_19, %c0_20] : memref<1152x256xbf16, #tpu.memory_space<vmem>>, vector<1152x256xbf16>
    %cst = arith.constant dense<0.000000e+00> : vector<56x256xf32>
    %52 = tpu.matmul %50, %51, %cst {dimension_numbers = #tpu.dot_dimension_numbers<[1], [0], [0], [1], [0, 0, 1, 1], [], []>} : vector<56x1152xbf16>, vector<1152x256xbf16>, vector<56x256xf32> -> vector<56x256xf32>
    %53 = vector.extract_strided_slice %52 {offsets = [0, 0], sizes = [56, 128], strides = [1, 1]} : vector<56x256xf32> to vector<56x128xf32>
    %c0_21 = arith.constant 0 : index
    %c0_22 = arith.constant 0 : index
    %54 = vector.load %arg7[%c0_21, %c0_22] : memref<1x128xf32, #tpu.memory_space<vmem>>, vector<1x128xf32>
    %55 = vector.broadcast %54 : vector<1x128xf32> to vector<56x128xf32>
    %56 = arith.mulf %53, %55 : vector<56x128xf32>
    %c0_23 = arith.constant 0 : index
    %c0_24 = arith.constant 0 : index
    %57 = vector.load %arg8[%c0_23, %c0_24] : memref<1x128xf32, #tpu.memory_space<vmem>>, vector<1x128xf32>
    %58 = vector.broadcast %57 : vector<1x128xf32> to vector<56x128xf32>
    %59 = arith.addf %56, %58 : vector<56x128xf32>
    %cst_25 = arith.constant 0.000000e+00 : f32
    %60 = vector.broadcast %cst_25 : f32 to vector<56x128xf32>
    %61 = arith.maximumf %59, %60 : vector<56x128xf32>
    %c4_i32_26 = arith.constant 4 : i32
    %62 = arith.subi %4, %c4_i32_26 : i32
    %63 = tpu.iota {dimensions = array<i32: 0>} : vector<56x1xi32>
    %64 = vector.broadcast %62 : i32 to vector<56x1xi32>
    %65 = arith.addi %64, %63 : vector<56x1xi32>
    %c0_i32_27 = arith.constant 0 : i32
    %66 = vector.broadcast %c0_i32_27 : i32 to vector<56x1xi32>
    %67 = arith.cmpi sge, %65, %66 : vector<56x1xi32>
    %c48_i32_28 = arith.constant 48 : i32
    %68 = vector.broadcast %c48_i32_28 : i32 to vector<56x1xi32>
    %69 = arith.cmpi slt, %65, %68 : vector<56x1xi32>
    %70 = arith.andi %67, %69 : vector<56x1xi1>
    %cst_29 = arith.constant 0.000000e+00 : f32
    %71 = vector.shape_cast %70 : vector<56x1xi1> to vector<56x1xi1>
    %72 = vector.broadcast %71 : vector<56x1xi1> to vector<56x128xi1>
    %73 = vector.broadcast %cst_29 : f32 to vector<56x128xf32>
    %74 = arith.select %72, %61, %73 : vector<56x128xi1>, vector<56x128xf32>
    %75 = arith.truncf %74 : vector<56x128xf32> to vector<56x128xbf16>
    %76 = vector.extract_strided_slice %75 {offsets = [0, 0], sizes = [48, 128], strides = [1, 1]} : vector<56x128xbf16> to vector<48x128xbf16>
    %77 = vector.extract_strided_slice %75 {offsets = [1, 0], sizes = [48, 128], strides = [1, 1]} : vector<56x128xbf16> to vector<48x128xbf16>
    %78 = vector.extract_strided_slice %75 {offsets = [2, 0], sizes = [48, 128], strides = [1, 1]} : vector<56x128xbf16> to vector<48x128xbf16>
    %79 = vector.extract_strided_slice %75 {offsets = [3, 0], sizes = [48, 128], strides = [1, 1]} : vector<56x128xbf16> to vector<48x128xbf16>
    %80 = vector.extract_strided_slice %75 {offsets = [4, 0], sizes = [48, 128], strides = [1, 1]} : vector<56x128xbf16> to vector<48x128xbf16>
    %81 = vector.extract_strided_slice %75 {offsets = [5, 0], sizes = [48, 128], strides = [1, 1]} : vector<56x128xbf16> to vector<48x128xbf16>
    %82 = vector.extract_strided_slice %75 {offsets = [6, 0], sizes = [48, 128], strides = [1, 1]} : vector<56x128xbf16> to vector<48x128xbf16>
    %83 = vector.extract_strided_slice %75 {offsets = [7, 0], sizes = [48, 128], strides = [1, 1]} : vector<56x128xbf16> to vector<48x128xbf16>
    %84 = vector.extract_strided_slice %75 {offsets = [8, 0], sizes = [48, 128], strides = [1, 1]} : vector<56x128xbf16> to vector<48x128xbf16>
    %85 = tpu.concatenate %76, %77, %78, %79, %80, %81, %82, %83, %84 in 1 : vector<48x128xbf16>, vector<48x128xbf16>, vector<48x128xbf16>, vector<48x128xbf16>, vector<48x128xbf16>, vector<48x128xbf16>, vector<48x128xbf16>, vector<48x128xbf16>, vector<48x128xbf16> -> vector<48x1152xbf16>
    %c0_30 = arith.constant 0 : index
    %c0_31 = arith.constant 0 : index
    %86 = vector.load %arg9[%c0_30, %c0_31] : memref<1152x128xbf16, #tpu.memory_space<vmem>>, vector<1152x128xbf16>
    %cst_32 = arith.constant dense<0.000000e+00> : vector<48x128xf32>
    %87 = tpu.matmul %85, %86, %cst_32 {dimension_numbers = #tpu.dot_dimension_numbers<[1], [0], [0], [1], [0, 0, 1, 1], [], []>} : vector<48x1152xbf16>, vector<1152x128xbf16>, vector<48x128xf32> -> vector<48x128xf32>
    %c0_33 = arith.constant 0 : index
    %c0_34 = arith.constant 0 : index
    %88 = vector.load %arg10[%c0_33, %c0_34] : memref<1x128xf32, #tpu.memory_space<vmem>>, vector<1x128xf32>
    %89 = vector.broadcast %88 : vector<1x128xf32> to vector<48x128xf32>
    %90 = arith.mulf %87, %89 : vector<48x128xf32>
    %c0_35 = arith.constant 0 : index
    %c0_36 = arith.constant 0 : index
    %91 = vector.load %arg11[%c0_35, %c0_36] : memref<1x128xf32, #tpu.memory_space<vmem>>, vector<1x128xf32>
    %92 = vector.broadcast %91 : vector<1x128xf32> to vector<48x128xf32>
    %93 = arith.addf %90, %92 : vector<48x128xf32>
    %94 = vector.extract_strided_slice %52 {offsets = [4, 128], sizes = [48, 128], strides = [1, 1]} : vector<56x256xf32> to vector<48x128xf32>
    %c0_37 = arith.constant 0 : index
    %c0_38 = arith.constant 0 : index
    %95 = vector.load %arg12[%c0_37, %c0_38] : memref<1x128xf32, #tpu.memory_space<vmem>>, vector<1x128xf32>
    %96 = vector.broadcast %95 : vector<1x128xf32> to vector<48x128xf32>
    %97 = arith.mulf %94, %96 : vector<48x128xf32>
    %c0_39 = arith.constant 0 : index
    %c0_40 = arith.constant 0 : index
    %98 = vector.load %arg13[%c0_39, %c0_40] : memref<1x128xf32, #tpu.memory_space<vmem>>, vector<1x128xf32>
    %99 = vector.broadcast %98 : vector<1x128xf32> to vector<48x128xf32>
    %100 = arith.addf %97, %99 : vector<48x128xf32>
    %101 = arith.addf %93, %100 : vector<48x128xf32>
    %cst_41 = arith.constant 0.000000e+00 : f32
    %102 = vector.broadcast %cst_41 : f32 to vector<48x128xf32>
    %103 = arith.maximumf %101, %102 : vector<48x128xf32>
    %104 = arith.truncf %103 : vector<48x128xf32> to vector<48x128xbf16>
    %c0_42 = arith.constant 0 : index
    %c0_43 = arith.constant 0 : index
    %c0_44 = arith.constant 0 : index
    %105 = vector.load %arg14[%c0_42, %c0_43, %c0_44] : memref<1x48x128xbf16, #tpu.memory_space<vmem>>, vector<1x48x128xbf16>
    %106 = vector.shape_cast %105 : vector<1x48x128xbf16> to vector<48x128xbf16>
    %107 = vector.shape_cast %104 : vector<48x128xbf16> to vector<1x48x128xbf16>
    tpu.vector_store %arg14[%c0_42, %c0_43, %c0_44], %107 {strides = array<i32>} : memref<1x48x128xbf16, #tpu.memory_space<vmem>>, vector<1x48x128xbf16>,
    return
  }
  func.func @transform_0(%arg0: i32, %arg1: i32) -> (i32, i32, i32) {
    %c0_i32 = arith.constant 0 : i32
    %c0_i32_0 = arith.constant 0 : i32
    %c0_i32_1 = arith.constant 0 : i32
    return %arg0, %c0_i32, %c0_i32_0 : i32, i32, i32
  }
  func.func @transform_1(%arg0: i32, %arg1: i32) -> (i32, i32) {
    %c0_i32 = arith.constant 0 : i32
    %c0_i32_0 = arith.constant 0 : i32
    %c0_i32_1 = arith.constant 0 : i32
    return %c0_i32, %c0_i32_0 : i32, i32
  }
  func.func @transform_2(%arg0: i32, %arg1: i32) -> (i32, i32) {
    %c0_i32 = arith.constant 0 : i32
    %c0_i32_0 = arith.constant 0 : i32
    %c0_i32_1 = arith.constant 0 : i32
    return %c0_i32, %c0_i32_0 : i32, i32
  }
  func.func @transform_3(%arg0: i32, %arg1: i32) -> (i32, i32) {
    %c0_i32 = arith.constant 0 : i32
    %c0_i32_0 = arith.constant 0 : i32
    %c0_i32_1 = arith.constant 0 : i32
    return %c0_i32, %c0_i32_0 : i32, i32
  }
  func.func @transform_4(%arg0: i32, %arg1: i32) -> (i32, i32) {
    %c0_i32 = arith.constant 0 : i32
    %c0_i32_0 = arith.constant 0 : i32
    %c0_i32_1 = arith.constant 0 : i32
    return %c0_i32, %c0_i32_0 : i32, i32
  }
  func.func @transform_5(%arg0: i32, %arg1: i32) -> (i32, i32) {
    %c0_i32 = arith.constant 0 : i32
    %c0_i32_0 = arith.constant 0 : i32
    %c0_i32_1 = arith.constant 0 : i32
    return %c0_i32, %c0_i32_0 : i32, i32
  }
  func.func @transform_6(%arg0: i32, %arg1: i32) -> (i32, i32) {
    %c0_i32 = arith.constant 0 : i32
    %c0_i32_0 = arith.constant 0 : i32
    %c0_i32_1 = arith.constant 0 : i32
    return %c0_i32, %c0_i32_0 : i32, i32
  }
  func.func @transform_7(%arg0: i32, %arg1: i32) -> (i32, i32) {
    %c0_i32 = arith.constant 0 : i32
    %c0_i32_0 = arith.constant 0 : i32
    %c0_i32_1 = arith.constant 0 : i32
    return %c0_i32, %c0_i32_0 : i32, i32
  }
  func.func @transform_8(%arg0: i32, %arg1: i32) -> (i32, i32) {
    %c0_i32 = arith.constant 0 : i32
    %c0_i32_0 = arith.constant 0 : i32
    %c0_i32_1 = arith.constant 0 : i32
    return %c0_i32, %c0_i32_0 : i32, i32
  }
  func.func @transform_9(%arg0: i32, %arg1: i32) -> (i32, i32) {
    %c0_i32 = arith.constant 0 : i32
    %c0_i32_0 = arith.constant 0 : i32
    %c0_i32_1 = arith.constant 0 : i32
    return %c0_i32, %c0_i32_0 : i32, i32
  }
  func.func @transform_10(%arg0: i32, %arg1: i32) -> (i32, i32) {
    %c0_i32 = arith.constant 0 : i32
    %c0_i32_0 = arith.constant 0 : i32
    %c0_i32_1 = arith.constant 0 : i32
    return %c0_i32, %c0_i32_0 : i32, i32
  }
  func.func @transform_11(%arg0: i32, %arg1: i32) -> (i32, i32) {
    %c0_i32 = arith.constant 0 : i32
    %c0_i32_0 = arith.constant 0 : i32
    %c0_i32_1 = arith.constant 0 : i32
    return %c0_i32, %c0_i32_0 : i32, i32
  }
  func.func @transform_12(%arg0: i32, %arg1: i32) -> (i32, i32, i32) {
    %c0_i32 = arith.constant 0 : i32
    %c0_i32_0 = arith.constant 0 : i32
    return %arg0, %arg1, %c0_i32 : i32, i32, i32
  }
}

</mosaic_0001>

<bundles_post_ra>
// kernel: tpu_custom_call.1
= control target key start
LH: loop header
LB: loop body
LE: loop exit
PB: predicated region body
PF: predicated region fallthrough
CT: control target
= control target key end

     0   :  { %s5284_s0 = inlined_call_operand.vmem [shape: bf16[2,96,40], index: 0, kind: input, shape index: {}]   ;;  %s5285_s1 = inlined_call_operand.vmem [shape: bf16[40,128], index: 1, kind: input, shape index: {}]   ;;  %s5286_s2 = inlined_call_operand.vmem [shape: f32[1,128], index: 2, kind: input, shape index: {}]   ;;  %s5287_s3 = inlined_call_operand.vmem [shape: f32[1,128], index: 3, kind: input, shape index: {}]   ;;  %s5288_s4 = inlined_call_operand.hbm [shape: bf16[1152,256], index: 4, kind: input, shape index: {}]   ;;  %s5289_s5 = inlined_call_operand.vmem [shape: f32[1,128], index: 5, kind: input, shape index: {}]   ;;  %s5290_s6 = inlined_call_operand.vmem [shape: f32[1,128], index: 6, kind: input, shape index: {}]   ;;  %s5291_s7 = inlined_call_operand.hbm [shape: bf16[1152,128], index: 7, kind: input, shape index: {}]   ;;  %s5292_s8 = inlined_call_operand.vmem [shape: f32[1,128], index: 8, kind: input, shape index: {}]   ;;  %s5293_s9 = inlined_call_operand.vmem [shape: f32[1,128], index: 9, kind: input, shape index: {}]   ;;  %s5294_s10 = inlined_call_operand.vmem [shape: f32[1,128], index: 10, kind: input, shape index: {}]   ;;  %s5295_s11 = inlined_call_operand.vmem [shape: f32[1,128], index: 11, kind: input, shape index: {}]   ;;  %s5296_s12 = inlined_call_operand.hbm [shape: bf16[2,48,128], index: 12, kind: output, shape index: {}]  }
   0x1   :  { %5309 = sst [smem:[#allocation19_spill]] %s5296_s12 }
   0x2   :  { %17 = vsyncpa [#allocation4], 0 }
   0x3   :  { %18 = vsyncpa [#allocation7], 0 }
   0x4   :  { %19 = vsyncpa [#allocation5], 0 }
   0x5   :  { %21 = vsyncpa [#allocation5 + $0x1], 0  ;;  %s4711_s21 = smov 0   ;;  %s4713_s22 = smov 0  }
   0x6   :  { %s4715_s23 = smov 0   ;;  %s4717_s24 = smov 0  }
   0x7   :  { %s4719_s25 = smov 0   ;;  %s4721_s26 = smov 0  }
   0x8 LB: > { %5310 = sst [smem:[#allocation12_spill]] %s4611_s21  ;;  %s3491_s27 = sadd.s32 4294967295, %s4631_s26   ;;  %s4631_s26 = sphi %s4721_s26, %s27_s26   ;;  %s4627_s25 = sphi %s4719_s25, %s5335_s25   ;;  %s4623_s24 = sphi %s4717_s24, %s5334_s24   ;;  %s4619_s23 = sphi %s4715_s23, %s5333_s23   ;;  %s4615_s22 = sphi %s4713_s22, %s5337_s22   ;;  %s4611_s21 = sphi %s4711_s21, %s5336_s21  }
   0x9   : > { %5311 = sst [smem:[#allocation13_spill]] %s4619_s23  ;;  %s3492_s28 = sadd.s32 4294967294, %s4631_s26  }
   0xa   : > { %5312 = sst [smem:[#allocation14_spill]] %s4627_s25  ;;  %s39_s29 = sadd.s32 1, %s4627_s25 }
   0xb   : > { %5313 = sst [smem:[#allocation15_spill]] %s4631_s26  ;;  %s305_s30 = sadd.s32 1, %s4619_s23 }
   0xc   : > { %p41_p0 = scmp.ge.s32.totalorder %s39_s29, 2  ;;  %p315_p1 = scmp.ne.s32.totalorder %s4619_s23, %s4615_s22 }
   0xd   : > { %p316_p2 = scmp.eq.s32.totalorder %s3491_s27, 1  ;;  %p321_p3 = scmp.ne.s32.totalorder %s4615_s22, %s4611_s21 }
   0xe   : > { %s5339_s29 = smov (%p41_p0, %s39_s29), 0  ;;  %p322_p5 = scmp.eq.s32.totalorder %s3492_s28, 1 }
   0xf   : > { %5314 = sst [smem:[#allocation16_spill]] %s5339_s29  ;;  %p4751_p4 = por %p316_p2, %p315_p1 }
  0x10   : > { %s300_s14 = ssub.s32 %s4627_s25, %s5339_s29  ;;  %p3493_p6 = scmp.ge.s32.totalorder %s4631_s26, 1 }
  0x11   : > { %s5315_s13 = scalar_select %p4751_p4, 1, 0 }
  0x12   : > { %p303_p7 = scmp.eq.s32.totalorder %s300_s14, 0  ;;  %p4758_p8 = por %p322_p5, %p321_p3 }
  0x13   : > { %p329_p9 = scmp.lt.s32.totalorder %s4631_s26, 3  ;;  %p4770_p11 = scmp.eq.s32.totalorder %s3491_s27, 0 }
  0x14   : > { %s5316_s15 = scalar_select %p4758_p8, 1, 0 }
  0x15   : > { %s4764_s16 = scalar_select %p303_p7, %s4619_s23, %s305_s30  }
  0x16   : > { %5317 = sst [smem:[#allocation17_spill]] %s5316_s15  ;;  %p4766_p10 = pnand %p3493_p6, %p329_p9 }
  0x17   : > { %5318 = sst [smem:[#allocation18_spill]] %s4764_s16  ;;  %s4633_s19 = smov [#allocation3]  }
  0x18   : > { %s5319_s17 = scalar_select %p4766_p10, 1, 0 }
  0x19   : > { %s5320_s18 = scalar_select %p4770_p11, 1, 0 }
  0x1a   : > { %p4115_p12 = pneg %p4766_p10  ;;  %s350_s20 = sshll.u32 %s4633_s19, 4  ;;  %s351_s20 = int_to_ptr.vmem [resolvable:$true] %s350_s20 }
  0x1b   : > { %s4634_s30 = smov [#allocation6]   ;;  %s4489_s25 = scalar_lea.hbm %s5288_s4, 18432 }
  0x1c   : > { %p4778_p13 = pnand %p4770_p11, %p4115_p12  ;;  %s369_s14 = sshll.u32 %s4634_s30, 4  ;;  %s4782_s14 = int_to_ptr.vmem [resolvable:$true] %s369_s14 }
  0x1d   : > { %p4490_p0 = scmp.ne.s32.totalorder %s5288_s4, %s4489_s25  ;;  %p4496_p5 = scmp.lt.u32.totalorder %s4489_s25, %s5288_s4 }
  0x1e   : > { %p4491_p1 = pneg %p4778_p13 }
  0x20   : > { %p4492_p2 = pnand %p4491_p1, %p4490_p0 }
  0x22   : > { %p4493_p3 = pneg %p4492_p2 }
  0x24   : > { %p4498_p6 = pnand %p4496_p5, %p4493_p3 }
  0x26   : > { %4501 = shalt.err (!%p4498_p6)
}
  0x27   : > { %s4502_s30 = scalar_lea.vmem %s351_s20, 18432  ;;  %p4510_p8 = scmp.lt.s32.totalorder %s351_s20, %s351_s20 }
  0x28   : > { %p4503_p7 = scmp.ne.s32.totalorder %s351_s20, %s4502_s30  ;;  %p4511_p4 = scmp.lt.s32.totalorder %s4502_s30, %s4502_s30 }
  0x2a   : > { %p4505_p9 = pnand %p4503_p7, %p4491_p1  ;;  %p4512_p11 = por %p4511_p4, %p4510_p8 }
  0x2c   : > { %p4506_p12 = pneg %p4505_p9 }
  0x2e   : > { %p4513_p10 = pnand %p4512_p11, %p4506_p12 }
  0x30   : > { %4516 = shalt.err (!%p4513_p10)
}
  0x31   : > { %s4635_s23 = smov 128   ;;  %s4636_s29 = smov 8  }
  0x32   : > { %4118 = dma.hbm_to_vmem [thread:$0]  (!%p4778_p13), %s5288_s4, 18432, %s351_s20, [#allocation4], %s4635_s23, %s4635_s23, %s4636_s29  }
  0x33   : > { %s4517_s19 = scalar_lea.hbm %s5291_s7, 9216 }
  0x34   : > { %p4518_p0 = scmp.ne.s32.totalorder %s5291_s7, %s4517_s19  ;;  %p4524_p10 = scmp.lt.u32.totalorder %s4517_s19, %s5291_s7 }
  0x36   : > { %p4520_p4 = pnand %p4518_p0, %p4491_p1 }
  0x38   : > { %p4521_p8 = pneg %p4520_p4 }
  0x3a   : > { %p4526_p11 = pnand %p4524_p10, %p4521_p8 }
  0x3c   : > { %4529 = shalt.err (!%p4526_p11)
}
  0x3d   : > { %s4530_s20 = scalar_lea.vmem %s4782_s14, 9216  ;;  %p4538_p6 = scmp.lt.s32.totalorder %s4782_s14, %s4782_s14 }
  0x3e   : > { %p4531_p2 = scmp.ne.s32.totalorder %s4782_s14, %s4530_s20  ;;  %p4539_p7 = scmp.lt.s32.totalorder %s4530_s20, %s4530_s20 }
  0x40   : > { %p4533_p3 = pnand %p4531_p2, %p4491_p1  ;;  %p4540_p9 = por %p4539_p7, %p4538_p6 }
  0x42   : > { %p4534_p5 = pneg %p4533_p3 }
  0x44   : > { %p4541_p12 = pnand %p4540_p9, %p4534_p5 }
  0x46   : > { %4544 = shalt.err (!%p4541_p12)
}
  0x47   : > { %s4637_s12 = smov 64   ;;  %s4638_s21 = smov 4  }
  0x48   : > { %4121 = dma.hbm_to_vmem [thread:$0]  (!%p4778_p13), %s5291_s7, 9216, %s4782_s14, [#allocation7], %s4637_s12, %s4637_s12, %s4638_s21  }
  0x49   : > { %p5322_p0 = scmp.ne.s32.totalorder %s5319_s17, 0 }
  0x4a   : > { %p5323_p1 = scmp.ne.s32.totalorder (!%p5322_p0), %s5320_s18, 0 }
  0x4b   : > { %405 = sbr.rel (%p5322_p0) target bundleno = 1114 (0x45a), region = 68 }
  0x52   : > { %4598 = dma.done.wait (%p5323_p1), [#allocation4], 18432  }
  0x53   : > { %4600 = vsyncadd (%p5323_p1), [#allocation4], 4294948864 }
  0x54   : > { %4602 = dma.done.wait (%p5323_p1), [#allocation7], 9216  }
  0x55   : > { %4604 = vsyncadd (%p5323_p1), [#allocation7], 4294958080  ;;  %p451_p4 = scmp.lt.s32.totalorder %s4623_s24, 1  ;;  %v4191_v0 = vld [vmem:[%s5285_s1] sm:$0xff]   ;;  %v4192_v1 = vld [vmem:[%s5285_s1 + $0x8] sm:$0xff]   ;;  %vm528_vm0 = vcmask 326656  }
  0x56   : > { %3993 = vmatprep.subr.bf16.mxu0 %v4191_v0  ;;  %v4193_v3 = vld [vmem:[%s5285_s1 + $0x10] ss:$0 sps:$4 sm:$0xff]   ;;  %vm547_vm1 = vcmask 1043456   ;;  %v4200_v7 = vld [vmem:[#allocation3 + $0x104] ss:$8 sps:$4 sm:$0xff]   ;;  %vm2219_vm4 = vcmask 1046528  }
  0x57   : > { %s452_s28 = scalar_select %p451_p4, %s4623_s24, 1  ;;  %3994 = vmatpush3.bf16.msra.mxu0 %v4191_v0  ;;  %v549_v4 = vsel %vm547_vm1, %v4193_v3, 0  ;;  %v4202_v8 = vld [vmem:[#allocation3] ss:$8 sps:$4 sm:$0xff]   ;;  %v4204_v9 = vld [vmem:[#allocation3 + $0x4] ss:$8 sps:$4 sm:$0xff]   ;;  %1801 = vmatprep.subr.bf16.mxu1 %v4200_v7 }
  0x58   : > { %3995 = vmatprep.subr.bf16.mxu0 %v4192_v1  ;;  %v4205_v10 = vld [vmem:[#allocation3 + $0x100] ss:$8 sps:$4 sm:$0xff]   ;;  %v4206_v11 = vld [vmem:[#allocation3 + $0x114] ss:$8 sps:$4 sm:$0xff]   ;;  %v4211_v13 = vld [vmem:[#allocation3 + $0x110] ss:$8 sps:$4 sm:$0xff]  }
  0x59   : > { %s4103_s14 = smul.u32 48, %s452_s28  ;;  %1802 = vmatpush1.bf16.msra.mxu1 %v4205_v10  ;;  %v4210_v12 = vld [vmem:[#allocation3 + $0x14] ss:$8 sps:$4 sm:$0xff]   ;;  %v4212_v14 = vld [vmem:[#allocation3 + $0x124] ss:$8 sps:$4 sm:$0xff]   ;;  %vm2251_vm5 = vcmask 1045504  }
  0x5a   : > { %1803 = vmatprep.subr.bf16.mxu1 %v4206_v11  ;;  %v4208_v15 = vld [vmem:[#allocation3 + $0x10] ss:$8 sps:$4 sm:$0xff]   ;;  %v4216_v17 = vld [vmem:[#allocation3 + $0x24] ss:$8 sps:$4 sm:$0xff]   ;;  %v4217_v18 = vld [vmem:[#allocation3 + $0x120] ss:$8 sps:$4 sm:$0xff]  }
  0x5b   : > { %s4849_s16 = scalar_lea.vmem %s5284_s0, %s4103_s14  ;;  %3996 = vmatpush3.bf16.msra.mxu0 %v4192_v1  ;;  %v4218_v20 = vld [vmem:[#allocation3 + $0x134] ss:$8 sps:$4 sm:$0xff]   ;;  %v4214_v21 = vld [vmem:[#allocation3 + $0x20] ss:$8 sps:$4 sm:$0xff]   ;;  %v4223_v23 = vld [vmem:[#allocation3 + $0x130] ss:$8 sps:$4 sm:$0xff]  }
  0x5c   : > { %v4194_v2 = vld [vmem:[%s4849_s16] sm:$0xff]   ;;  %4101 = vmatprep.subr.msk.bf16.mxu0 %vm547_vm1, %v4193_v3  ;;  %v4195_v5 = vld [vmem:[%s4849_s16 + $0x8] sm:$0xff]   ;;  %v4196_v6 = vld [vmem:[%s4849_s16 + $0x10] sm:$0xff]   ;;  %vm2183_vm3 = vsmask.f32 7424  ;;  %vm4641_vm9 = vmmov 1  }
  0x5d   : > { %3999 = vmatprep.mubr.msk.bf16.mxu0 %vm528_vm0, %v4194_v2  ;;  %v4197_v16 = vld [vmem:[%s4849_s16 + $0x18] sm:$0xff]   ;;  %1804 = vmatpush1.bf16.msra.mxu1 %v4211_v13  ;;  %v4198_v19 = vld [vmem:[%s4849_s16 + $0x20] sm:$0xff]   ;;  %v4222_v22 = vld [vmem:[#allocation3 + $0x34] ss:$8 sps:$4 sm:$0xff]   ;;  %v4639_v2 = vmov 0.0   ;;  %vm2281_vm12 = vcmask 1044480  }
  0x5e   : > { %1805 = vmatprep.subr.bf16.mxu1 %v4212_v14  ;;  %v4224_v24 = vld [vmem:[#allocation3 + $0x144] ss:$8 sps:$4 sm:$0xff]   ;;  %v4220_v25 = vld [vmem:[#allocation3 + $0x30] ss:$8 sps:$4 sm:$0xff]   ;;  %v4229_v27 = vld [vmem:[#allocation3 + $0x140] ss:$8 sps:$4 sm:$0xff]  }
  0x5f   : > { %3998 = vmatpush3.bf16.msra.mxu0 %v549_v4  ;;  %v4228_v26 = vld [vmem:[#allocation3 + $0x44] ss:$8 sps:$4 sm:$0xff]   ;;  %v4199_v28 = vld [vmem:[%s4849_s16 + $0x28] sm:$0xff]   ;;  %v4226_v30 = vld [vmem:[#allocation3 + $0x40] ss:$8 sps:$4 sm:$0xff]   ;;  %462 = vst [vmem:[#allocation2] sm:$0xff] %v4639_v2 }
  0x60   : > { %1730 = vmatprep.subr.bf16.mxu0 %v4204_v9  ;;  %v4230_v29 = vld [vmem:[#allocation3 + $0x154] ss:$8 sps:$4 sm:$0xff]   ;;  %v4235_v32 = vld [vmem:[#allocation3 + $0x150] ss:$8 sps:$4 sm:$0xff]   ;;  %v4236_v33 = vld [vmem:[#allocation3 + $0x164] ss:$8 sps:$4 sm:$0xff]  }
  0x61   : > { %1806 = vmatpush1.bf16.msra.mxu1 %v4217_v18  ;;  %v4234_v31 = vld [vmem:[#allocation3 + $0x54] ss:$8 sps:$4 sm:$0xff]   ;;  %v4232_v34 = vld [vmem:[#allocation3 + $0x50] ss:$8 sps:$4 sm:$0xff]   ;;  %v4240_v35 = vld [vmem:[#allocation3 + $0x64] ss:$8 sps:$4 sm:$0xff]  }
  0x62   : > { %4000 = vmatmul.mubr.msk.bf16.vlgmr.msra.gmra.mrb[0].mxu0 %vm528_vm0, %v4195_v5  ;;  %1807 = vmatprep.subr.bf16.mxu1 %v4218_v20  ;;  %v4241_v36 = vld [vmem:[#allocation3 + $0x160] ss:$8 sps:$4 sm:$0xff]   ;;  %v4242_v37 = vld [vmem:[#allocation3 + $0x174] ss:$8 sps:$4 sm:$0xff]   ;;  %v4244_v40 = vld [vmem:[#allocation3 + $0x70] ss:$8 sps:$4 sm:$0xff]  }
  0x63   : > { %4003 = vmatprep.mubr.msk.bf16.mxu0 %vm528_vm0, %v4196_v6  ;;  %1731 = vmatpush1.bf16.msra.mxu0 %v4202_v8  ;;  %v4238_v38 = vld [vmem:[#allocation3 + $0x60] ss:$8 sps:$4 sm:$0xff]   ;;  %v4246_v39 = vld [vmem:[#allocation3 + $0x74] ss:$8 sps:$4 sm:$0xff]   ;;  %v4247_v41 = vld [vmem:[#allocation3 + $0x170] ss:$8 sps:$4 sm:$0xff]  }
  0x64   : > { %1732 = vmatprep.subr.bf16.mxu0 %v4210_v12  ;;  %v4248_v42 = vld [vmem:[#allocation3 + $0x184] ss:$8 sps:$4 sm:$0xff]   ;;  %v4253_v44 = vld [vmem:[#allocation3 + $0x180] ss:$8 sps:$4 sm:$0xff]   ;;  %v4254_v45 = vld [vmem:[#allocation3 + $0x194] ss:$8 sps:$4 sm:$0xff]  }
  0x65   : > { %1808 = vmatpush1.bf16.msra.mxu1 %v4223_v23  ;;  %v4252_v43 = vld [vmem:[#allocation3 + $0x84] ss:$8 sps:$4 sm:$0xff]   ;;  %v4250_v46 = vld [vmem:[#allocation3 + $0x80] ss:$8 sps:$4 sm:$0xff]   ;;  %v4258_v47 = vld [vmem:[#allocation3 + $0x94] ss:$8 sps:$4 sm:$0xff]  }
  0x66   : > { %1809 = vmatprep.subr.bf16.mxu1 %v4224_v24  ;;  %v4259_v48 = vld [vmem:[#allocation3 + $0x190] ss:$8 sps:$4 sm:$0xff]   ;;  %v4260_v49 = vld [vmem:[#allocation3 + $0x1a4] ss:$8 sps:$4 sm:$0xff]   ;;  %v4265_v52 = vld [vmem:[#allocation3 + $0x1a0] ss:$8 sps:$4 sm:$0xff]  }
  0x67   : > { %1733 = vmatpush1.bf16.msra.mxu0 %v4208_v15  ;;  %v4256_v50 = vld [vmem:[#allocation3 + $0x90] ss:$8 sps:$4 sm:$0xff]   ;;  %v4264_v51 = vld [vmem:[#allocation3 + $0xa4] ss:$8 sps:$4 sm:$0xff]   ;;  %v4262_v53 = vld [vmem:[#allocation3 + $0xa0] ss:$8 sps:$4 sm:$0xff]  }
  0x68   : > { %1734 = vmatprep.subr.bf16.mxu0 %v4216_v17  ;;  %v4266_v54 = vld [vmem:[#allocation3 + $0x1b4] ss:$8 sps:$4 sm:$0xff]   ;;  %v4271_v56 = vld [vmem:[#allocation3 + $0x1b0] ss:$8 sps:$4 sm:$0xff]   ;;  %v4272_v58 = vld [vmem:[#allocation3 + $0x1c4] ss:$8 sps:$4 sm:$0xff]  }
  0x69   : > { %1810 = vmatpush1.bf16.msra.mxu1 %v4229_v27  ;;  %v4270_v55 = vld [vmem:[#allocation3 + $0xb4] ss:$8 sps:$4 sm:$0xff]   ;;  %v4268_v57 = vld [vmem:[#allocation3 + $0xb0] ss:$8 sps:$4 sm:$0xff]   ;;  %v4276_v59 = vld [vmem:[#allocation3 + $0xc4] ss:$8 sps:$4 sm:$0xff]  }
  0x6a   : > { %4004 = vmatmul.mubr.msk.bf16.gmra.mrb[4].mxu0 %vm528_vm0, %v4197_v16  ;;  %1811 = vmatprep.subr.bf16.mxu1 %v4230_v29  ;;  %v4277_v60 = vld [vmem:[#allocation3 + $0x1c0] ss:$8 sps:$4 sm:$0xff]   ;;  %v4278_v62 = vld [vmem:[#allocation3 + $0x1d4] ss:$8 sps:$4 sm:$0xff]   ;;  %v4283_v0 = vld [vmem:[#allocation3 + $0x1d0] ss:$8 sps:$4 sm:$0xff]  }
  0x6b   : > { %4007 = vmatprep.mubr.msk.bf16.mxu0 %vm528_vm0, %v4198_v19  ;;  %1735 = vmatpush1.bf16.msra.mxu0 %v4214_v21  ;;  %v4274_v61 = vld [vmem:[#allocation3 + $0xc0] ss:$8 sps:$4 sm:$0xff]   ;;  %v4282_v63 = vld [vmem:[#allocation3 + $0xd4] ss:$8 sps:$4 sm:$0xff]   ;;  %v4280_v1 = vld [vmem:[#allocation3 + $0xd0] ss:$8 sps:$4 sm:$0xff]  }
  0x6c   : > { %1736 = vmatprep.subr.bf16.mxu0 %v4222_v22  ;;  %463 = vst [vmem:[#allocation2 + $0x8] sm:$0xf] %v4639_v2  ;;  %464 = vst [vmem:[#allocation2 + $0x6c] sm:$0xff] %v4639_v2  ;;  %v4284_v3 = vld [vmem:[#allocation3 + $0x1e4] ss:$8 sps:$4 sm:$0xff]   ;;  %vm4642_vm13 = vmmov 0  }
  0x6d   : > { %1812 = vmatpush1.bf16.msra.mxu1 %v4235_v32  ;;  %465 = vst [vmem:[#allocation2 + $0x74] sm:$0xf] %v4639_v2  ;;  %v4288_v4 = vld [vmem:[#allocation3 + $0xe4] ss:$8 sps:$4 sm:$0xff]   ;;  %v4289_v5 = vld [vmem:[#allocation3 + $0x1e0] ss:$8 sps:$4 sm:$0xff]  }
  0x6e   : > { %1813 = vmatprep.subr.bf16.mxu1 %v4236_v33  ;;  %v4286_v6 = vld [vmem:[#allocation3 + $0xe0] ss:$8 sps:$4 sm:$0xff]   ;;  %v4290_v7 = vld [vmem:[#allocation3 + $0x1f4] ss:$8 sps:$4 sm:$0xff]   ;;  %v4295_v9 = vld [vmem:[#allocation3 + $0x1f0] ss:$8 sps:$4 sm:$0xff]  }
  0x6f   : > { %1737 = vmatpush1.bf16.msra.mxu0 %v4220_v25  ;;  %v4294_v8 = vld [vmem:[#allocation3 + $0xf4] ss:$8 sps:$4 sm:$0xff]   ;;  %v4292_v10 = vld [vmem:[#allocation3 + $0xf0] ss:$8 sps:$4 sm:$0xff]   ;;  %v4298_v11 = vld [vmem:[#allocation3 + $0x204] ss:$8 sps:$4 sm:$0xff]  }
  0x70   : > { %1738 = vmatprep.subr.bf16.mxu0 %v4228_v26  ;;  %v4874_v12 = vld [vmem:[%s5286_s2] ss:$0 sm:$0xff]  ;;  %vm2230_vm6 = vsmask.f32 6400  ;;  %vm2262_vm7 = vsmask.f32 5376 }
  0x71   : > { %1814 = vmatpush1.bf16.msra.mxu1 %v4241_v36  ;;  %v4879_v14 = vld [vmem:[%s5287_s3] ss:$0 sm:$0xff]  ;;  %vm2292_vm11 = vsmask.f32 4352  ;;  %s448_s20 = sand.u32 1, %s4615_s22   ;;  %s4104_s26 = smul.u32 384, %s4623_s24 }
  0x72   : > { %4008 = vmatmul.mubr.msk.bf16.gmra.mrb[8].mxu0 %vm528_vm0, %v4199_v28  ;;  %1815 = vmatprep.subr.bf16.mxu1 %v4242_v37  ;;  %s4102_s12 = smul.u32 24, %s448_s20  ;;  %s5326_s29 = sld [smem:[#allocation19_spill]] }
  0x73   : > { %1739 = vmatpush1.bf16.msra.mxu0 %v4226_v30  ;;  %s5238_s25 = scalar_lea.sflag [#allocation5], %s448_s20  ;;  %p5327_p8 = scmp.ne.s32.totalorder %s5315_s13, 0 }
  0x74   : > { %1740 = vmatprep.subr.bf16.mxu0 %v4234_v31  ;;  %s450_s21 = scalar_lea.vmem [#allocation8], %s4102_s12  ;;  %s4643_s15 = smov [#allocation8]  }
  0x75   : > { %1816 = vmatpush1.bf16.msra.mxu1 %v4247_v41  ;;  %s3322_s23 = sshll.u32 %s450_s21, 4  ;;  %s4549_s16 = sshll.u32 %s4643_s15, 4  ;;  %s5234_s23 = int_to_ptr.vmem [resolvable:$true] %s3322_s23  ;;  %s4550_s16 = int_to_ptr.vmem [resolvable:$false] %s4549_s16 }
  0x76   : > { %1817 = vmatprep.subr.bf16.mxu1 %v4248_v42  ;;  %s4545_s24 = scalar_lea.vmem %s5234_s23, 384  ;;  %s4551_s27 = scalar_lea.vmem %s4550_s16, 768 }
  0x77   : > { %1741 = vmatpush1.bf16.msra.mxu0 %v4232_v34  ;;  %p4546_p13 = scmp.ne.s32.totalorder %s5234_s23, %s4545_s24  ;;  %p4552_p2 = scmp.lt.s32.totalorder %s5234_s23, %s4550_s16 }
  0x78   : > { %1742 = vmatprep.subr.bf16.mxu0 %v4240_v35  ;;  %s5232_s17 = scalar_lea.hbm %s5326_s29, %s4104_s26  ;;  %p4553_p3 = scmp.lt.s32.totalorder %s4551_s27, %s4545_s24 }
  0x79   : > { %1818 = vmatpush1.bf16.msra.mxu1 %v4253_v44  ;;  %p4547_p10 = pnand %p4546_p13, %p5327_p8 }
  0x7a   : > { %1819 = vmatprep.subr.bf16.mxu1 %v4254_v45  ;;  %p4554_p5 = por %p4553_p3, %p4552_p2 }
  0x7b   : > { %1743 = vmatpush1.bf16.msra.mxu0 %v4238_v38  ;;  %p4548_p11 = pneg %p4547_p10 }
  0x7c   : > { %1744 = vmatprep.subr.bf16.mxu0 %v4246_v39 }
  0x7d   : > { %1820 = vmatpush1.bf16.msra.mxu1 %v4259_v48  ;;  %p4555_p6 = pnand %p4554_p5, %p4548_p11 }
  0x7e   : > { %1821 = vmatprep.subr.bf16.mxu1 %v4260_v49  ;;  %v4296_v49 = vld [vmem:[#allocation3 + $0x200] ss:$8 sps:$4 sm:$0xff]  }
  0x7f   : > { %1745 = vmatpush1.bf16.msra.mxu0 %v4244_v40 }
  0x80   : > { %1746 = vmatprep.subr.bf16.mxu0 %v4252_v43 }
  0x81   : > { %1822 = vmatpush1.bf16.msra.mxu1 %v4265_v52 }
  0x82   : > { %1823 = vmatprep.subr.bf16.mxu1 %v4266_v54 }
  0x83   : > { %1747 = vmatpush1.bf16.msra.mxu0 %v4250_v46 }
  0x84   : > { %1748 = vmatprep.subr.bf16.mxu0 %v4258_v47 }
  0x85   : > { %1824 = vmatpush1.bf16.msra.mxu1 %v4271_v56 }
  0x86   : > { %1825 = vmatprep.subr.bf16.mxu1 %v4272_v58 }
  0x87   : > { %1749 = vmatpush1.bf16.msra.mxu0 %v4256_v50 }
  0x88   : > { %1750 = vmatprep.subr.bf16.mxu0 %v4264_v51 }
  0x89   : > { %1826 = vmatpush1.bf16.msra.mxu1 %v4277_v60 }
  0x8a   : > { %1827 = vmatprep.subr.bf16.mxu1 %v4278_v62 }
  0x8b   : > { %1751 = vmatpush1.bf16.msra.mxu0 %v4262_v53 }
  0x8c   : > { %1752 = vmatprep.subr.bf16.mxu0 %v4270_v55 }
  0x8d   : > { %1828 = vmatpush1.bf16.msra.mxu1 %v4283_v0 }
  0x8e   : > { %1829 = vmatprep.subr.bf16.mxu1 %v4284_v3  ;;  %v4301_v3 = vld [vmem:[#allocation3 + $0x214] ss:$8 sps:$4 sm:$0xff]  }
  0x8f   : > { %1753 = vmatpush1.bf16.msra.mxu0 %v4268_v57 }
  0x90   : > { %1754 = vmatprep.subr.bf16.mxu0 %v4276_v59 }
  0x91   : > { %1830 = vmatpush1.bf16.msra.mxu1 %v4289_v5 }
  0x92   : > { %1831 = vmatprep.subr.bf16.mxu1 %v4290_v7 }
  0x93   : > { %1755 = vmatpush1.bf16.msra.mxu0 %v4274_v61 }
  0x94   : > { %1756 = vmatprep.subr.bf16.mxu0 %v4282_v63 }
  0x95   : > { %1832 = vmatpush1.bf16.msra.mxu1 %v4295_v9 }
  0x96   : > { %1872 = vmatprep.subr.bf16.mxu1 %v4298_v11 }
  0x97   : > { %1757 = vmatpush1.bf16.msra.mxu0 %v4280_v1 }
  0x98   : > { %1758 = vmatprep.subr.bf16.mxu0 %v4288_v4 }
  0x9b   : > { %1759 = vmatpush1.bf16.msra.mxu0 %v4286_v6 }
  0x9c   : > { %1760 = vmatprep.subr.bf16.mxu0 %v4294_v8 }
  0x9f   : > { %1761 = vmatpush1.bf16.msra.mxu0 %v4292_v10  ;;  %v4299_v10 = vld [vmem:[#allocation3 + $0x210] ss:$8 sps:$4 sm:$0xff]  }
 0x135   : > { %v4001_v13 = vpop.f32.mrb[0].mxu0 }
 0x136   : > { %v641_v15 = vmul.f32 %v4001_v13, %v4874_v12  ;;  %v585_v16 = vpop.f32.mrb[1].mxu0 }
 0x137   : > { %v639_v17 = vmul.f32 %v4874_v12, %v585_v16  ;;  %v4002_v18 = vpop.f32.mrb[2].mxu0 }
 0x138   : > { %v660_v19 = vadd.f32 %v4879_v14, %v641_v15  ;;  %v642_v20 = vmul.f32 %v4002_v18, %v4874_v12  ;;  %v588_v21 = vpop.f32.mrb[3].mxu0  ;;  %v4304_v15 = vld [vmem:[#allocation3 + $0x224] ss:$8 sps:$4 sm:$0xff]  }
 0x139   : > { %v658_v22 = vadd.f32 %v4879_v14, %v639_v17  ;;  %v640_v23 = vmul.f32 %v4874_v12, %v588_v21 }
 0x13a   : > { %v672_v24 = vmax.f32 %v660_v19, 0.0  ;;  %v661_v25 = vadd.f32 %v4879_v14, %v642_v20 }
 0x13b   : > { %v670_v26 = vmax.f32 %v658_v22, 0.0  ;;  %v659_v27 = vadd.f32 %v4879_v14, %v640_v23 }
 0x13c   : > { %684 = vst [vmem:[#allocation2 + $0x1c] sm:$0xff] %v672_v24  ;;  %v673_v28 = vmax.f32 %v661_v25, 0.0 }
 0x13d   : > { %682 = vst [vmem:[#allocation2 + $0xc] sm:$0xff] %v670_v26  ;;  %v671_v29 = vmax.f32 %v659_v27, 0.0  ;;  %v4005_v30 = vpop.f32.mrb[4].mxu0  ;;  %v4307_v27 = vld [vmem:[#allocation3 + $0x234] ss:$8 sps:$4 sm:$0xff]  }
 0x13e   : > { %685 = vst [vmem:[#allocation2 + $0x24] sm:$0xff] %v673_v28  ;;  %v645_v31 = vmul.f32 %v4005_v30, %v4874_v12  ;;  %v601_v32 = vpop.f32.mrb[5].mxu0  ;;  %v4305_v28 = vld [vmem:[#allocation3 + $0x230] ss:$8 sps:$4 sm:$0xff]  }
 0x13f   : > { %683 = vst [vmem:[#allocation2 + $0x14] sm:$0xff] %v671_v29  ;;  %v643_v33 = vmul.f32 %v4874_v12, %v601_v32  ;;  %v4006_v34 = vpop.f32.mrb[6].mxu0  ;;  %v4310_v29 = vld [vmem:[#allocation3 + $0x244] ss:$8 sps:$4 sm:$0xff]  }
 0x140   : > { %v664_v35 = vadd.f32 %v4879_v14, %v645_v31  ;;  %v646_v36 = vmul.f32 %v4006_v34, %v4874_v12  ;;  %v604_v37 = vpop.f32.mrb[7].mxu0 }
 0x141   : > { %v662_v38 = vadd.f32 %v4879_v14, %v643_v33  ;;  %v644_v39 = vmul.f32 %v4874_v12, %v604_v37 }
 0x142   : > { %v676_v40 = vmax.f32 %v664_v35, 0.0  ;;  %v665_v41 = vadd.f32 %v4879_v14, %v646_v36 }
 0x143   : > { %v674_v42 = vmax.f32 %v662_v38, 0.0  ;;  %v663_v43 = vadd.f32 %v4879_v14, %v644_v39  ;;  %v4308_v39 = vld [vmem:[#allocation3 + $0x240] ss:$8 sps:$4 sm:$0xff]  }
 0x144   : > { %688 = vst [vmem:[#allocation2 + $0x3c] sm:$0xff] %v676_v40  ;;  %v677_v44 = vmax.f32 %v665_v41, 0.0  ;;  %v3524_v45 = vld [vmem:[#allocation2 + $0x1] ss:$2 sm:$0xff]  ;;  %v697_v50 = vld [vmem:[#allocation2] ss:$2 sm:$0xff] }
 0x145   : > { %v3538_v46 = vld [vmem:[#allocation2 + $0x3] ss:$2 sm:$0xff]  ;;  %686 = vst [vmem:[#allocation2 + $0x2c] sm:$0xff] %v674_v42  ;;  %v675_v47 = vmax.f32 %v663_v43, 0.0  ;;  %v4009_v48 = vpop.f32.mrb[8].mxu0 }
 0x146   : > { %v3531_v51 = vld [vmem:[#allocation2 + $0x2] ss:$2 sm:$0xff]  ;;  %689 = vst [vmem:[#allocation2 + $0x44] sm:$0xff] %v677_v44  ;;  %v649_v52 = vmul.f32 %v4009_v48, %v4874_v12  ;;  %v617_v53 = vpop.f32.mrb[9].mxu0  ;;  %v3525_v54 = vld [vmem:[#allocation2 + $0x11] ss:$2 sm:$0xff] }
 0x147   : > { %v3539_v55 = vld [vmem:[#allocation2 + $0x13] ss:$2 sm:$0xff]  ;;  %687 = vst [vmem:[#allocation2 + $0x34] sm:$0xff] %v675_v47  ;;  %v647_v56 = vmul.f32 %v4874_v12, %v617_v53  ;;  %v4010_v57 = vpop.f32.mrb[10].mxu0  ;;  %v729_v58 = vpack.c.bf16 %v3525_v54, %v3524_v45  ;;  %v3518_v60 = vld [vmem:[#allocation2 + $0x10] ss:$2 sm:$0xff] }
 0x148   : > { %v767_v59 = vpack.c.bf16 %v3539_v55, %v3538_v46  ;;  %v3532_v61 = vld [vmem:[#allocation2 + $0x12] ss:$2 sm:$0xff]  ;;  %v668_v62 = vadd.f32 %v4879_v14, %v649_v52  ;;  %v650_v63 = vmul.f32 %v4010_v57, %v4874_v12  ;;  %v620_v0 = vpop.f32.mrb[11].mxu0  ;;  %v710_v1 = vpack.c.bf16 %v3518_v60, %v697_v50  ;;  %v3553_v53 = vld [vmem:[#allocation2 + $0x15] ss:$2 sm:$0xff] }
 0x149   : > { %v748_v2 = vpack.c.bf16 %v3532_v61, %v3531_v51  ;;  %v666_v4 = vadd.f32 %v4879_v14, %v647_v56  ;;  %v648_v5 = vmul.f32 %v4874_v12, %v620_v0  ;;  %1762 = vmatprep.mubr.bf16.mxu0 %v729_v58  ;;  %v4313_v45 = vld [vmem:[#allocation3 + $0x254] ss:$8 sps:$4 sm:$0xff]   ;;  %v4311_v48 = vld [vmem:[#allocation3 + $0x250] ss:$8 sps:$4 sm:$0xff]   ;;  %v4316_v51 = vld [vmem:[#allocation3 + $0x264] ss:$8 sps:$4 sm:$0xff]  }
 0x14a   : > { %1833 = vmatprep.mubr.bf16.mxu1 %v767_v59  ;;  %v680_v6 = vmax.f32 %v668_v62, 0.0  ;;  %v669_v7 = vadd.f32 %v4879_v14, %v650_v63  ;;  %1763 = vmatmul.mubr.bf16.vlgmr.msra.gmra.mrb[12].mxu0 %v710_v1  ;;  %v4314_v55 = vld [vmem:[#allocation3 + $0x260] ss:$8 sps:$4 sm:$0xff]   ;;  %v3552_v56 = vld [vmem:[#allocation2 + $0x5] ss:$2 sm:$0xff] }
 0x14b   : > { %1834 = vmatmul.mubr.bf16.vlgmr.msra.gmra.mrb[0].mxu1 %v748_v2  ;;  %v678_v8 = vmax.f32 %v666_v4, 0.0  ;;  %v667_v9 = vadd.f32 %v4879_v14, %v648_v5  ;;  %v4302_v14 = vld [vmem:[#allocation3 + $0x220] ss:$8 sps:$4 sm:$0xff]   ;;  %v4319_v57 = vld [vmem:[#allocation3 + $0x274] ss:$8 sps:$4 sm:$0xff]   ;;  %v805_v58 = vpack.c.bf16 %v3553_v53, %v3552_v56 }
 0x14c   : > { %1873 = vmatpush1.bf16.msra.mxu1 %v4296_v49  ;;  %692 = vst [vmem:[#allocation2 + $0x5c] sm:$0xff] %v680_v6  ;;  %v681_v11 = vmax.f32 %v669_v7, 0.0  ;;  %v3526_v13 = vld [vmem:[#allocation2 + $0x21] ss:$2 sm:$0xff]  ;;  %v3519_v17 = vld [vmem:[#allocation2 + $0x20] ss:$2 sm:$0xff] }
 0x14d   : > { %1874 = vmatprep.subr.bf16.mxu1 %v4301_v3  ;;  %690 = vst [vmem:[#allocation2 + $0x4c] sm:$0xff] %v678_v8  ;;  %v679_v16 = vmax.f32 %v667_v9, 0.0  ;;  %v3540_v12 = vld [vmem:[#allocation2 + $0x23] ss:$2 sm:$0xff]  ;;  %v3533_v24 = vld [vmem:[#allocation2 + $0x22] ss:$2 sm:$0xff] }
 0x14e   : > { %693 = vst [vmem:[#allocation2 + $0x64] sm:$0xff] %v681_v11  ;;  %v3527_v18 = vld [vmem:[#allocation2 + $0x31] ss:$2 sm:$0xff]  ;;  %v3520_v20 = vld [vmem:[#allocation2 + $0x30] ss:$2 sm:$0xff] }
 0x14f   : > { %v3541_v19 = vld [vmem:[#allocation2 + $0x33] ss:$2 sm:$0xff]  ;;  %691 = vst [vmem:[#allocation2 + $0x54] sm:$0xff] %v679_v16  ;;  %v730_v21 = vpack.c.bf16 %v3527_v18, %v3526_v13  ;;  %v711_v23 = vpack.c.bf16 %v3520_v20, %v3519_v17  ;;  %v3534_v25 = vld [vmem:[#allocation2 + $0x32] ss:$2 sm:$0xff] }
 0x150   : > { %1875 = vmatpush1.bf16.msra.mxu1 %v4299_v10  ;;  %v768_v22 = vpack.c.bf16 %v3541_v19, %v3540_v12  ;;  %v749_v26 = vpack.c.bf16 %v3534_v25, %v3533_v24  ;;  %v4317_v59 = vld [vmem:[#allocation3 + $0x270] ss:$8 sps:$4 sm:$0xff]   ;;  %v4322_v60 = vld [vmem:[#allocation3 + $0x284] ss:$8 sps:$4 sm:$0xff]   ;;  %v4320_v61 = vld [vmem:[#allocation3 + $0x280] ss:$8 sps:$4 sm:$0xff]  }
 0x151   : > { %1876 = vmatprep.subr.bf16.mxu1 %v4304_v15  ;;  %1772 = vmatprep.mubr.bf16.mxu0 %v730_v21  ;;  %v4325_v62 = vld [vmem:[#allocation3 + $0x294] ss:$8 sps:$4 sm:$0xff]   ;;  %v4323_v63 = vld [vmem:[#allocation3 + $0x290] ss:$8 sps:$4 sm:$0xff]   ;;  %v4328_v0 = vld [vmem:[#allocation3 + $0x2a4] ss:$8 sps:$4 sm:$0xff]  }
 0x152   : > { %1843 = vmatprep.mubr.bf16.mxu1 %v768_v22  ;;  %1773 = vmatmul.mubr.bf16.gmra.mrb[16].mxu0 %v711_v23  ;;  %v4326_v1 = vld [vmem:[#allocation3 + $0x2a0] ss:$8 sps:$4 sm:$0xff]   ;;  %v4331_v2 = vld [vmem:[#allocation3 + $0x2b4] ss:$8 sps:$4 sm:$0xff]   ;;  %v4329_v3 = vld [vmem:[#allocation3 + $0x2b0] ss:$8 sps:$4 sm:$0xff]  }
 0x153   : > { %1844 = vmatmul.mubr.bf16.gmra.mrb[4].mxu1 %v749_v26  ;;  %v4334_v4 = vld [vmem:[#allocation3 + $0x2c4] ss:$8 sps:$4 sm:$0xff]   ;;  %v4332_v5 = vld [vmem:[#allocation3 + $0x2c0] ss:$8 sps:$4 sm:$0xff]   ;;  %v4337_v6 = vld [vmem:[#allocation3 + $0x2d4] ss:$8 sps:$4 sm:$0xff]  }
 0x154   : > { %1877 = vmatpush1.bf16.msra.mxu1 %v4302_v14  ;;  %v3542_v30 = vld [vmem:[#allocation2 + $0x43] ss:$2 sm:$0xff]  ;;  %v3535_v31 = vld [vmem:[#allocation2 + $0x42] ss:$2 sm:$0xff] }
 0x155   : > { %1878 = vmatprep.subr.bf16.mxu1 %v4307_v27  ;;  %v3528_v32 = vld [vmem:[#allocation2 + $0x41] ss:$2 sm:$0xff]  ;;  %v3521_v34 = vld [vmem:[#allocation2 + $0x40] ss:$2 sm:$0xff] }
 0x156   : > { %v3544_v33 = vld [vmem:[#allocation2 + $0x63] ss:$2 sm:$0xff]  ;;  %v3543_v35 = vld [vmem:[#allocation2 + $0x53] ss:$2 sm:$0xff]  ;;  %v3536_v36 = vld [vmem:[#allocation2 + $0x52] ss:$2 sm:$0xff] }
 0x157   : > { %v3529_v37 = vld [vmem:[#allocation2 + $0x51] ss:$2 sm:$0xff]  ;;  %v769_v38 = vpack.c.bf16 %v3543_v35, %v3542_v30  ;;  %v750_v40 = vpack.c.bf16 %v3536_v36, %v3535_v31  ;;  %v770_v41 = vpack.c.bf16 %v3544_v33, %v3544_v33  ;;  %v3522_v43 = vld [vmem:[#allocation2 + $0x50] ss:$2 sm:$0xff]  ;;  %v3530_v44 = vld [vmem:[#allocation2 + $0x61] ss:$2 sm:$0xff] }
 0x158   : > { %1879 = vmatpush1.bf16.msra.mxu1 %v4305_v28  ;;  %v731_v42 = vpack.c.bf16 %v3529_v37, %v3528_v32  ;;  %v712_v46 = vpack.c.bf16 %v3522_v43, %v3521_v34  ;;  %v732_v47 = vpack.c.bf16 %v3530_v44, %v3530_v44  ;;  %v3537_v49 = vld [vmem:[#allocation2 + $0x62] ss:$2 sm:$0xff]  ;;  %v3555_v16 = vld [vmem:[#allocation2 + $0x35] ss:$2 sm:$0xff]  ;;  %v3554_v19 = vld [vmem:[#allocation2 + $0x25] ss:$2 sm:$0xff] }
 0x159   : > { %1880 = vmatprep.subr.bf16.mxu1 %v4310_v29  ;;  %1853 = vmatprep.mubr.bf16.mxu1 %v769_v38  ;;  %v3523_v50 = vld [vmem:[#allocation2 + $0x60] ss:$2 sm:$0xff]  ;;  %v751_v52 = vpack.c.bf16 %v3537_v49, %v3537_v49  ;;  %v806_v21 = vpack.c.bf16 %v3555_v16, %v3554_v19  ;;  %v3556_v24 = vld [vmem:[#allocation2 + $0x45] ss:$2 sm:$0xff]  ;;  %v3557_v25 = vld [vmem:[#allocation2 + $0x55] ss:$2 sm:$0xff] }
 0x15a   : > { %1782 = vmatprep.mubr.bf16.mxu0 %v731_v42  ;;  %v713_v54 = vpack.c.bf16 %v3523_v50, %v3523_v50  ;;  %v4335_v7 = vld [vmem:[#allocation3 + $0x2d0] ss:$8 sps:$4 sm:$0xff]   ;;  %v4340_v8 = vld [vmem:[#allocation3 + $0x2e4] ss:$8 sps:$4 sm:$0xff]   ;;  %v4338_v9 = vld [vmem:[#allocation3 + $0x2e0] ss:$8 sps:$4 sm:$0xff]   ;;  %v807_v30 = vpack.c.bf16 %v3557_v25, %v3556_v24 }
 0x15b   : > { %1854 = vmatmul.mubr.bf16.gmra.mrb[8].mxu1 %v750_v40  ;;  %1783 = vmatmul.mubr.bf16.gmra.mrb[20].mxu0 %v712_v46  ;;  %v4343_v10 = vld [vmem:[#allocation3 + $0x2f4] ss:$8 sps:$4 sm:$0xff]   ;;  %v4341_v11 = vld [vmem:[#allocation3 + $0x2f0] ss:$8 sps:$4 sm:$0xff]   ;;  %v4346_v13 = vld [vmem:[#allocation3 + $0x304] ss:$8 sps:$4 sm:$0xff]  }
 0x15c   : > { %1881 = vmatpush1.bf16.msra.mxu1 %v4308_v39  ;;  %1863 = vmatprep.mubr.bf16.mxu1 %v770_v41  ;;  %v3546_v15 = vld [vmem:[#allocation2 + $0x14] ss:$2 sm:$0xff]  ;;  %v3545_v12 = vld [vmem:[#allocation2 + $0x4] ss:$2 sm:$0xff]  ;;  %v3558_v35 = vld [vmem:[#allocation2 + $0x65] ss:$2 sm:$0xff] }
 0x15d   : > { %1882 = vmatprep.subr.bf16.mxu1 %v4313_v45  ;;  %1792 = vmatprep.mubr.bf16.mxu0 %v732_v47  ;;  %v4344_v17 = vld [vmem:[#allocation3 + $0x300] ss:$8 sps:$4 sm:$0xff]   ;;  %v786_v18 = vpack.c.bf16 %v3546_v15, %v3545_v12  ;;  %v4349_v20 = vld [vmem:[#allocation3 + $0x314] ss:$8 sps:$4 sm:$0xff]   ;;  %v4347_v22 = vld [vmem:[#allocation3 + $0x310] ss:$8 sps:$4 sm:$0xff]   ;;  %v808_v39 = vpack.c.bf16 %v3558_v35, %v3558_v35 }
 0x15e   : > { %v4352_v14 = vld [vmem:[#allocation3 + $0x324] ss:$8 sps:$4 sm:$0xff]   ;;  %v4350_v27 = vld [vmem:[#allocation3 + $0x320] ss:$8 sps:$4 sm:$0xff]   ;;  %v4355_v29 = vld [vmem:[#allocation3 + $0x334] ss:$8 sps:$4 sm:$0xff]  }
 0x15f   : > { %v3548_v23 = vld [vmem:[#allocation2 + $0x34] ss:$2 sm:$0xff]  ;;  %v3547_v26 = vld [vmem:[#allocation2 + $0x24] ss:$2 sm:$0xff]  ;;  %v3566_v43 = vld [vmem:[#allocation2 + $0x7] ss:$2 sm:$0xff] }
 0x160   : > { %1883 = vmatpush1.bf16.msra.mxu1 %v4311_v48  ;;  %v787_v28 = vpack.c.bf16 %v3548_v23, %v3547_v26  ;;  %v4353_v31 = vld [vmem:[#allocation3 + $0x330] ss:$8 sps:$4 sm:$0xff]   ;;  %v4358_v32 = vld [vmem:[#allocation3 + $0x344] ss:$8 sps:$4 sm:$0xff]   ;;  %v4356_v36 = vld [vmem:[#allocation3 + $0x340] ss:$8 sps:$4 sm:$0xff]  }
 0x161   : > { %1884 = vmatprep.subr.bf16.mxu1 %v4316_v51  ;;  %v3549_v33 = vld [vmem:[#allocation2 + $0x44] ss:$2 sm:$0xff]  ;;  %v3550_v34 = vld [vmem:[#allocation2 + $0x54] ss:$2 sm:$0xff]  ;;  %v3567_v44 = vld [vmem:[#allocation2 + $0x17] ss:$2 sm:$0xff] }
 0x162   : > { %v788_v37 = vpack.c.bf16 %v3550_v34, %v3549_v33  ;;  %v4361_v38 = vld [vmem:[#allocation3 + $0x354] ss:$8 sps:$4 sm:$0xff]   ;;  %v4359_v40 = vld [vmem:[#allocation3 + $0x350] ss:$8 sps:$4 sm:$0xff]   ;;  %v4364_v41 = vld [vmem:[#allocation3 + $0x364] ss:$8 sps:$4 sm:$0xff]   ;;  %v843_v48 = vpack.c.bf16 %v3567_v44, %v3566_v43 }
 0x163   : > { %1864 = vmatmul.mubr.bf16.gmra.mrb[12].mxu1 %v751_v52  ;;  %1793 = vmatmul.mubr.bf16.gmra.mrb[24].mxu0 %v713_v54  ;;  %v3551_v42 = vld [vmem:[#allocation2 + $0x64] ss:$2 sm:$0xff]  ;;  %v4362_v45 = vld [vmem:[#allocation3 + $0x360] ss:$8 sps:$4 sm:$0xff]  }
 0x164   : > { %1885 = vmatpush1.bf16.msra.mxu1 %v4314_v55  ;;  %1904 = vmatprep.mubr.bf16.mxu1 %v805_v58  ;;  %v789_v46 = vpack.c.bf16 %v3551_v42, %v3551_v42  ;;  %v4367_v47 = vld [vmem:[#allocation3 + $0x374] ss:$8 sps:$4 sm:$0xff]   ;;  %v4365_v49 = vld [vmem:[#allocation3 + $0x370] ss:$8 sps:$4 sm:$0xff]   ;;  %v4370_v50 = vld [vmem:[#allocation3 + $0x384] ss:$8 sps:$4 sm:$0xff]  }
 0x165   : > { %1886 = vmatprep.subr.bf16.mxu1 %v4319_v57  ;;  %v4368_v51 = vld [vmem:[#allocation3 + $0x380] ss:$8 sps:$4 sm:$0xff]   ;;  %v4373_v52 = vld [vmem:[#allocation3 + $0x394] ss:$8 sps:$4 sm:$0xff]   ;;  %v4371_v53 = vld [vmem:[#allocation3 + $0x390] ss:$8 sps:$4 sm:$0xff]  }
 0x166   : > { %v4376_v54 = vld [vmem:[#allocation3 + $0x3a4] ss:$8 sps:$4 sm:$0xff]   ;;  %v4374_v55 = vld [vmem:[#allocation3 + $0x3a0] ss:$8 sps:$4 sm:$0xff]   ;;  %v4379_v56 = vld [vmem:[#allocation3 + $0x3b4] ss:$8 sps:$4 sm:$0xff]  }
 0x167   : > { %v4377_v57 = vld [vmem:[#allocation3 + $0x3b0] ss:$8 sps:$4 sm:$0xff]   ;;  %v4382_v58 = vld [vmem:[#allocation3 + $0x3c4] ss:$8 sps:$4 sm:$0xff]   ;;  %v4397_v15 = vld [vmem:[#allocation3 + $0x414] ss:$8 sps:$4 sm:$0xff]  }
 0x168   : > { %1887 = vmatpush1.bf16.msra.mxu1 %v4317_v59  ;;  %v4380_v59 = vld [vmem:[#allocation3 + $0x3c0] ss:$8 sps:$4 sm:$0xff]   ;;  %v4395_v12 = vld [vmem:[#allocation3 + $0x410] ss:$8 sps:$4 sm:$0xff]   ;;  %v4403_v23 = vld [vmem:[#allocation3 + $0x434] ss:$8 sps:$4 sm:$0xff]  }
 0x169   : > { %1888 = vmatprep.subr.bf16.mxu1 %v4322_v60  ;;  %v4385_v60 = vld [vmem:[#allocation3 + $0x3d4] ss:$8 sps:$4 sm:$0xff]   ;;  %v4401_v25 = vld [vmem:[#allocation3 + $0x430] ss:$8 sps:$4 sm:$0xff]   ;;  %v4406_v26 = vld [vmem:[#allocation3 + $0x444] ss:$8 sps:$4 sm:$0xff]  }
 0x16a   : > { %v3562_v19 = vld [vmem:[#allocation2 + $0x36] ss:$2 sm:$0xff]  ;;  %v4407_v34 = vld [vmem:[#allocation3 + $0x450] ss:$8 sps:$4 sm:$0xff]  }
 0x16b   : > { %v4412_v35 = vld [vmem:[#allocation3 + $0x464] ss:$8 sps:$4 sm:$0xff]   ;;  %v3573_v42 = vld [vmem:[#allocation2 + $0x8] ss:$2 sm:$0xff] }
 0x16c   : > { %1889 = vmatpush1.bf16.msra.mxu1 %v4320_v61  ;;  %v4416_v61 = vld [vmem:[#allocation6 + $0x40] sm:$0xff]  }
 0x16d   : > { %1890 = vmatprep.subr.bf16.mxu1 %v4325_v62  ;;  %v4417_v62 = vld [vmem:[#allocation6] sm:$0xff]   ;;  %3846 = vmatprep.subr.bf16.mxu0 %v4416_v61 }
 0x16e   : > { %3847 = vmatpush3.bf16.msra.mxu0 %v4417_v62  ;;  %v3574_v43 = vld [vmem:[#allocation2 + $0x18] ss:$2 sm:$0xff] }
 0x16f   : > { %v862_v44 = vpack.c.bf16 %v3574_v43, %v3573_v42 }
 0x170   : > { %1891 = vmatpush1.bf16.msra.mxu1 %v4323_v63  ;;  %v4418_v63 = vld [vmem:[#allocation6 + $0x48] sm:$0xff]  }
 0x171   : > { %1892 = vmatprep.subr.bf16.mxu1 %v4328_v0  ;;  %v4383_v0 = vld [vmem:[#allocation3 + $0x3d0] ss:$8 sps:$4 sm:$0xff]   ;;  %3848 = vmatprep.subr.bf16.mxu0 %v4418_v63 }
 0x174   : > { %1893 = vmatpush1.bf16.msra.mxu1 %v4326_v1  ;;  %v4419_v1 = vld [vmem:[#allocation6 + $0x8] sm:$0xff]  }
 0x175   : > { %1894 = vmatprep.subr.bf16.mxu1 %v4331_v2  ;;  %v4388_v2 = vld [vmem:[#allocation3 + $0x3e4] ss:$8 sps:$4 sm:$0xff]   ;;  %3849 = vmatpush3.bf16.msra.mxu0 %v4419_v1 }
 0x178   : > { %1895 = vmatpush1.bf16.msra.mxu1 %v4329_v3  ;;  %v4386_v3 = vld [vmem:[#allocation3 + $0x3e0] ss:$8 sps:$4 sm:$0xff]  }
 0x179   : > { %1896 = vmatprep.subr.bf16.mxu1 %v4334_v4  ;;  %v4391_v4 = vld [vmem:[#allocation3 + $0x3f4] ss:$8 sps:$4 sm:$0xff]  }
 0x17c   : > { %1897 = vmatpush1.bf16.msra.mxu1 %v4332_v5  ;;  %v4389_v5 = vld [vmem:[#allocation3 + $0x3f0] ss:$8 sps:$4 sm:$0xff]  }
 0x17d   : > { %1898 = vmatprep.subr.bf16.mxu1 %v4337_v6  ;;  %v4394_v6 = vld [vmem:[#allocation3 + $0x404] ss:$8 sps:$4 sm:$0xff]  }
 0x180   : > { %1899 = vmatpush1.bf16.msra.mxu1 %v4335_v7  ;;  %v3559_v7 = vld [vmem:[#allocation2 + $0x6] ss:$2 sm:$0xff] }
 0x181   : > { %1900 = vmatprep.subr.bf16.mxu1 %v4340_v8  ;;  %v3560_v8 = vld [vmem:[#allocation2 + $0x16] ss:$2 sm:$0xff] }
 0x184   : > { %1901 = vmatpush1.bf16.msra.mxu1 %v4338_v9  ;;  %v3568_v9 = vld [vmem:[#allocation2 + $0x27] ss:$2 sm:$0xff] }
 0x185   : > { %1902 = vmatprep.subr.bf16.mxu1 %v4343_v10  ;;  %v3569_v10 = vld [vmem:[#allocation2 + $0x37] ss:$2 sm:$0xff] }
 0x186   : > { %v844_v16 = vpack.c.bf16 %v3569_v10, %v3568_v9  ;;  %v4424_v9 = vld [vmem:[#allocation6 + $0x60] sm:$0xff]  }
 0x187   : > { %v4425_v10 = vld [vmem:[#allocation6 + $0x20] sm:$0xff]  }
 0x188   : > { %1903 = vmatpush1.bf16.msra.mxu1 %v4341_v11  ;;  %v4392_v11 = vld [vmem:[#allocation3 + $0x400] ss:$8 sps:$4 sm:$0xff]  }
 0x189   : > { %1943 = vmatprep.subr.bf16.mxu1 %v4346_v13  ;;  %v824_v13 = vpack.c.bf16 %v3560_v8, %v3559_v7  ;;  %v4422_v7 = vld [vmem:[#allocation6 + $0x58] sm:$0xff]  }
 0x18a   : > { %v4423_v8 = vld [vmem:[#allocation6 + $0x18] sm:$0xff]  }
 0x18b   : > { %1905 = vmatmul.mubr.bf16.vlgmr.msra.gmra.mrb[0].mxu1 %v786_v18  ;;  %v3561_v18 = vld [vmem:[#allocation2 + $0x26] ss:$2 sm:$0xff] }
 0x18c   : > { %1914 = vmatprep.mubr.bf16.mxu1 %v806_v21  ;;  %1944 = vmatpush1.bf16.msra.mxu1 %v4344_v17  ;;  %v4400_v17 = vld [vmem:[#allocation3 + $0x424] ss:$8 sps:$4 sm:$0xff]  }
 0x18d   : > { %1945 = vmatprep.subr.bf16.mxu1 %v4349_v20  ;;  %v3570_v20 = vld [vmem:[#allocation2 + $0x47] ss:$2 sm:$0xff]  ;;  %v3571_v21 = vld [vmem:[#allocation2 + $0x57] ss:$2 sm:$0xff] }
 0x18e   : > { %v845_v24 = vpack.c.bf16 %v3571_v21, %v3570_v20 }
 0x190   : > { %1946 = vmatpush1.bf16.msra.mxu1 %v4347_v22  ;;  %v4398_v22 = vld [vmem:[#allocation3 + $0x420] ss:$8 sps:$4 sm:$0xff]  }
 0x191   : > { %1947 = vmatprep.subr.bf16.mxu1 %v4352_v14  ;;  %v825_v14 = vpack.c.bf16 %v3562_v19, %v3561_v18  ;;  %v4432_v18 = vld [vmem:[#allocation6 + $0xc0] sm:$0xff]   ;;  %v2121_v19 = vlaneseq }
 0x193   : > { %1915 = vmatmul.mubr.bf16.gmra.mrb[4].mxu1 %v787_v28  ;;  %v3564_v28 = vld [vmem:[#allocation2 + $0x56] ss:$2 sm:$0xff]  ;;  %v2122_v20 = vshrl.u32 %v2121_v19, 7 }
 0x194   : > { %1924 = vmatprep.mubr.bf16.mxu1 %v807_v30  ;;  %1948 = vmatpush1.bf16.msra.mxu1 %v4350_v27  ;;  %v3563_v27 = vld [vmem:[#allocation2 + $0x46] ss:$2 sm:$0xff]  ;;  %v4404_v30 = vld [vmem:[#allocation3 + $0x440] ss:$8 sps:$4 sm:$0xff]  }
 0x195   : > { %1949 = vmatprep.subr.bf16.mxu1 %v4355_v29  ;;  %v3572_v29 = vld [vmem:[#allocation2 + $0x67] ss:$2 sm:$0xff]  ;;  %v2128_v43 = vadd.s32 48, %v2122_v20 }
 0x196   : > { %v846_v33 = vpack.c.bf16 %v3572_v29, %v3572_v29 }
 0x198   : > { %1950 = vmatpush1.bf16.msra.mxu1 %v4353_v31  ;;  %v826_v31 = vpack.c.bf16 %v3564_v28, %v3563_v27 }
 0x199   : > { %1951 = vmatprep.subr.bf16.mxu1 %v4358_v32  ;;  %v4409_v32 = vld [vmem:[#allocation3 + $0x454] ss:$8 sps:$4 sm:$0xff]  }
 0x19b   : > { %1925 = vmatmul.mubr.bf16.gmra.mrb[8].mxu1 %v788_v37  ;;  %v4410_v37 = vld [vmem:[#allocation3 + $0x460] ss:$8 sps:$4 sm:$0xff]  }
 0x19c   : > { %1934 = vmatprep.mubr.bf16.mxu1 %v808_v39  ;;  %1952 = vmatpush1.bf16.msra.mxu1 %v4356_v36  ;;  %v3565_v36 = vld [vmem:[#allocation2 + $0x66] ss:$2 sm:$0xff] }
 0x19d   : > { %1953 = vmatprep.subr.bf16.mxu1 %v4361_v38  ;;  %v827_v38 = vpack.c.bf16 %v3565_v36, %v3565_v36  ;;  %v4415_v39 = vld [vmem:[#allocation3 + $0x474] ss:$8 sps:$4 sm:$0xff]  }
 0x1a0   : > { %1954 = vmatpush1.bf16.msra.mxu1 %v4359_v40  ;;  %v4413_v40 = vld [vmem:[#allocation3 + $0x470] ss:$8 sps:$4 sm:$0xff]  }
 0x1a1   : > { %1955 = vmatprep.subr.bf16.mxu1 %v4364_v41  ;;  %v4640_v41 = vmov 0  }
 0x1a3   : > { %1935 = vmatmul.mubr.bf16.gmra.mrb[12].mxu1 %v789_v46  ;;  %v3576_v46 = vld [vmem:[#allocation2 + $0x38] ss:$2 sm:$0xff] }
 0x1a4   : > { %1956 = vmatpush1.bf16.msra.mxu1 %v4362_v45  ;;  %1975 = vmatprep.mubr.bf16.mxu1 %v843_v48  ;;  %v3575_v45 = vld [vmem:[#allocation2 + $0x28] ss:$2 sm:$0xff] }
 0x1a5   : > { %1957 = vmatprep.subr.bf16.mxu1 %v4367_v47  ;;  %v863_v47 = vpack.c.bf16 %v3576_v46, %v3575_v45  ;;  %v3577_v48 = vld [vmem:[#allocation2 + $0x48] ss:$2 sm:$0xff] }
 0x1a8   : > { %1958 = vmatpush1.bf16.msra.mxu1 %v4365_v49  ;;  %v3578_v49 = vld [vmem:[#allocation2 + $0x58] ss:$2 sm:$0xff] }
 0x1a9   : > { %1959 = vmatprep.subr.bf16.mxu1 %v4370_v50  ;;  %v864_v50 = vpack.c.bf16 %v3578_v49, %v3577_v48 }
 0x1ac   : > { %1960 = vmatpush1.bf16.msra.mxu1 %v4368_v51  ;;  %v3579_v51 = vld [vmem:[#allocation2 + $0x68] ss:$2 sm:$0xff] }
 0x1ad   : > { %1961 = vmatprep.subr.bf16.mxu1 %v4373_v52  ;;  %v865_v52 = vpack.c.bf16 %v3579_v51, %v3579_v51 }
 0x1b0   : > { %1962 = vmatpush1.bf16.msra.mxu1 %v4371_v53 }
 0x1b1   : > { %1963 = vmatprep.subr.bf16.mxu1 %v4376_v54 }
 0x1b4   : > { %1964 = vmatpush1.bf16.msra.mxu1 %v4374_v55 }
 0x1b5   : > { %1965 = vmatprep.subr.bf16.mxu1 %v4379_v56 }
 0x1b8   : > { %1966 = vmatpush1.bf16.msra.mxu1 %v4377_v57 }
 0x1b9   : > { %1967 = vmatprep.subr.bf16.mxu1 %v4382_v58 }
 0x1bc   : > { %1968 = vmatpush1.bf16.msra.mxu1 %v4380_v59 }
 0x1bd   : > { %1969 = vmatprep.subr.bf16.mxu1 %v4385_v60 }
 0x1c0   : > { %1970 = vmatpush1.bf16.msra.mxu1 %v4383_v0 }
 0x1c1   : > { %1971 = vmatprep.subr.bf16.mxu1 %v4388_v2 }
 0x1c4   : > { %1972 = vmatpush1.bf16.msra.mxu1 %v4386_v3 }
 0x1c5   : > { %1973 = vmatprep.subr.bf16.mxu1 %v4391_v4 }
 0x1c8   : > { %1974 = vmatpush1.bf16.msra.mxu1 %v4389_v5  ;;  %v4420_v5 = vld [vmem:[#allocation6 + $0x50] sm:$0xff]  }
 0x1c9   : > { %2014 = vmatprep.subr.bf16.mxu1 %v4394_v6  ;;  %v4421_v6 = vld [vmem:[#allocation6 + $0x10] sm:$0xff]   ;;  %3850 = vmatprep.subr.bf16.mxu0 %v4420_v5 }
 0x1ca   : > { %3851 = vmatpush3.bf16.msra.mxu0 %v4421_v6 }
 0x1cb   : > { %1976 = vmatmul.mubr.bf16.vlgmr.msra.gmra.mrb[0].mxu1 %v824_v13  ;;  %3852 = vmatprep.subr.bf16.mxu0 %v4422_v7  ;;  %v4427_v13 = vld [vmem:[#allocation6 + $0x28] sm:$0xff]  }
 0x1cc   : > { %1985 = vmatprep.mubr.bf16.mxu1 %v844_v16  ;;  %2015 = vmatpush1.bf16.msra.mxu1 %v4392_v11  ;;  %v4426_v11 = vld [vmem:[#allocation6 + $0x68] sm:$0xff]   ;;  %v4429_v16 = vld [vmem:[#allocation6 + $0x30] sm:$0xff]  }
 0x1cd   : > { %2016 = vmatprep.subr.bf16.mxu1 %v4397_v15  ;;  %v4428_v15 = vld [vmem:[#allocation6 + $0x70] sm:$0xff]  }
 0x1ce   : > { %3853 = vmatpush3.bf16.msra.mxu0 %v4423_v8 }
 0x1cf   : > { %3854 = vmatprep.subr.bf16.mxu0 %v4424_v9 }
 0x1d0   : > { %2017 = vmatpush1.bf16.msra.mxu1 %v4395_v12  ;;  %v4430_v12 = vld [vmem:[#allocation6 + $0x78] sm:$0xff]  }
 0x1d1   : > { %2018 = vmatprep.subr.bf16.mxu1 %v4400_v17  ;;  %v4431_v17 = vld [vmem:[#allocation6 + $0x38] sm:$0xff]  }
 0x1d2   : > { %3855 = vmatpush3.bf16.msra.mxu0 %v4425_v10 }
 0x1d3   : > { %1986 = vmatmul.mubr.bf16.gmra.mrb[4].mxu1 %v825_v14  ;;  %3856 = vmatprep.subr.bf16.mxu0 %v4426_v11 }
 0x1d4   : > { %1995 = vmatprep.mubr.bf16.mxu1 %v845_v24  ;;  %2019 = vmatpush1.bf16.msra.mxu1 %v4398_v22  ;;  %v4928_v22 = vld [vmem:[%s5289_s5] ss:$0 sm:$0xff] }
 0x1d5   : > { %2020 = vmatprep.subr.bf16.mxu1 %v4403_v23  ;;  %v4933_v24 = vld [vmem:[%s5294_s10] ss:$0 sm:$0xff] }
 0x1d6   : > { %3857 = vmatpush3.bf16.msra.mxu0 %v4427_v13 }
 0x1d7   : > { %3858 = vmatprep.subr.bf16.mxu0 %v4428_v15 }
 0x1d8   : > { %2021 = vmatpush1.bf16.msra.mxu1 %v4401_v25  ;;  %v4938_v25 = vld [vmem:[%s5290_s6] ss:$0 sm:$0xff] }
 0x1d9   : > { %2022 = vmatprep.subr.bf16.mxu1 %v4406_v26  ;;  %v4940_v26 = vadd.s32 4294967292, %v2122_v20 }
 0x1da   : > { %3859 = vmatpush3.bf16.msra.mxu0 %v4429_v16 }
 0x1db   : > { %1996 = vmatmul.mubr.bf16.gmra.mrb[8].mxu1 %v826_v31  ;;  %3860 = vmatprep.subr.bf16.mxu0 %v4430_v12  ;;  %vm2137_vm2 = vcmp.ge.s32.totalorder %v4940_v26, 0 }
 0x1dc   : > { %2005 = vmatprep.mubr.bf16.mxu1 %v846_v33  ;;  %2023 = vmatpush1.bf16.msra.mxu1 %v4404_v30  ;;  %v4946_v30 = vld [vmem:[%s5295_s11] ss:$0 sm:$0xff]  ;;  %vm5040_vm10 = vmpackc.low %vm4641_vm9, %vm2137_vm2 }
 0x1dd   : > { %2024 = vmatprep.subr.bf16.mxu1 %v4409_v32 }
 0x1de   : > { %3861 = vmatpush3.bf16.msra.mxu0 %v4431_v17 }
 0x1df   : > { %3880 = vmatprep.subr.bf16.mxu0 %v4432_v18 }
 0x1e0   : > { %2025 = vmatpush1.bf16.msra.mxu1 %v4407_v34 }
 0x1e1   : > { %2026 = vmatprep.subr.bf16.mxu1 %v4412_v35 }
 0x1e3   : > { %2006 = vmatmul.mubr.bf16.gmra.mrb[12].mxu1 %v827_v38 }
 0x1e4   : > { %2027 = vmatpush1.bf16.msra.mxu1 %v4410_v37  ;;  %2046 = vmatprep.mubr.bf16.mxu1 %v4640_v41 }
 0x1e5   : > { %2028 = vmatprep.subr.bf16.mxu1 %v4415_v39 }
 0x1e8   : > { %2029 = vmatpush1.bf16.msra.mxu1 %v4413_v40 }
 0x1eb   : > { %2047 = vmatmul.mubr.bf16.vlgmr.msra.gmra.mrb[0].mxu1 %v862_v44 }
 0x1ec   : > { %2056 = vmatprep.mubr.bf16.mxu1 %v4640_v41 }
 0x1f3   : > { %2057 = vmatmul.mubr.bf16.gmra.mrb[4].mxu1 %v863_v47 }
 0x1f4   : > { %2066 = vmatprep.mubr.bf16.mxu1 %v4640_v41 }
 0x1fb   : > { %2067 = vmatmul.mubr.bf16.gmra.mrb[8].mxu1 %v864_v50 }
 0x1fc   : > { %2076 = vmatprep.mubr.bf16.mxu1 %v4640_v41 }
 0x203   : > { %2077 = vmatmul.mubr.bf16.gmra.mrb[12].mxu1 %v865_v52 }
 0x21d   : > { %v1764_v53 = vpop.f32.mrb[12].mxu0 }
 0x21e   : > { %v1766_v54 = vpop.f32.mrb[13].mxu0 }
 0x21f   : > { %v1768_v55 = vpop.f32.mrb[14].mxu0 }
 0x220   : > { %v1770_v56 = vpop.f32.mrb[15].mxu0 }
 0x225   : > { %v4905_v57 = vpop.f32.mrb[16].mxu0 }
 0x226   : > { %v4907_v58 = vpop.f32.mrb[17].mxu0 }
 0x227   : > { %v4909_v59 = vpop.f32.mrb[18].mxu0 }
 0x228   : > { %v4911_v60 = vpop.f32.mrb[19].mxu0 }
 0x22e   : > { %v4913_v61 = vpop.f32.mrb[20].mxu0 }
 0x22f   : > { %v4915_v62 = vpop.f32.mrb[21].mxu0 }
 0x230   : > { %v4917_v63 = vpop.f32.mrb[22].mxu0 }
 0x231   : > { %v4919_v0 = vpop.f32.mrb[23].mxu0 }
 0x236   : > { %v4921_v1 = vpop.f32.mrb[24].mxu0 }
 0x237   : > { %v4923_v2 = vpop.f32.mrb[25].mxu0 }
 0x238   : > { %v1798_v3 = vpop.f32.mrb[26].mxu0 }
 0x239   : > { %v1799_v4 = vpop.f32.mrb[27].mxu0 }
 0x23a   : > { %v4971_v4 = vadd.s32 4294967292, %v2128_v43 }
 0x23c   : > { %vm2150_vm8 = vcmp.lt.s32.totalorder %v4971_v4, 48 }
 0x2be   : > { %v2048_v21 = vpop.f32.mrb[0].mxu1 }
 0x2bf   : > { %v4039_v14 = vadd.f32 %v2048_v21, %v1764_v53  ;;  %v2050_v23 = vpop.f32.mrb[1].mxu1 }
 0x2c0   : > { %v4040_v27 = vadd.f32 %v2050_v23, %v1766_v54  ;;  %v2052_v28 = vpop.f32.mrb[2].mxu1 }
 0x2c1   : > { %v2092_v29 = vmul.f32 %v4039_v14, %v4928_v22  ;;  %v4041_v31 = vadd.f32 %v2052_v28, %v1768_v55  ;;  %v2054_v32 = vpop.f32.mrb[3].mxu1 }
 0x2c2   : > { %v3216_v33 = vmul.f32 %v4040_v27, %v4933_v24  ;;  %v4042_v34 = vadd.f32 %v2054_v32, %v1770_v56 }
 0x2c3   : > { %v2106_v35 = vadd.f32 %v4938_v25, %v2092_v29  ;;  %v2093_v36 = vmul.f32 %v4041_v31, %v4928_v22 }
 0x2c4   : > { %v3230_v37 = vadd.f32 %v4946_v30, %v3216_v33  ;;  %v3217_v38 = vmul.f32 %v4042_v34, %v4933_v24 }
 0x2c5   : > { %v2113_v39 = vmax.f32 %v2106_v35, 0.0  ;;  %v2107_v40 = vadd.f32 %v4938_v25, %v2093_v36 }
 0x2c6   : > { %v4956_v41 = vadd.f32 %v4946_v30, %v3217_v38  ;;  %v2058_v42 = vpop.f32.mrb[4].mxu1  ;;  %v3245_v48 = vrot.slane %v3230_v37, 4 }
 0x2c7   : > { %v2172_v44 = vsel %vm2137_vm2, %v2113_v39, 0.0  ;;  %v2114_v45 = vmax.f32 %v2107_v40, 0.0  ;;  %v4043_v46 = vadd.f32 %v2058_v42, %v4905_v57  ;;  %v2060_v47 = vpop.f32.mrb[5].mxu1 }
 0x2c8   : > { %v3246_v49 = vrot.slane %v4956_v41, 4  ;;  %v4044_v50 = vadd.f32 %v2060_v47, %v4907_v58  ;;  %v2062_v51 = vpop.f32.mrb[6].mxu1 }
 0x2c9   : > { %v4963_v52 = vpack.c.bf16 %v2114_v45, %v2172_v44  ;;  %v4965_v53 = vpack.c.bf16 %v2114_v45, %v2113_v39  ;;  %v2094_v54 = vmul.f32 %v4043_v46, %v4928_v22  ;;  %v4045_v55 = vadd.f32 %v2062_v51, %v4909_v59  ;;  %v2064_v56 = vpop.f32.mrb[7].mxu1 }
 0x2ca   : > { %v3218_v3 = vmul.f32 %v4044_v50, %v4933_v24  ;;  %v4046_v57 = vadd.f32 %v2064_v56, %v4911_v60  ;;  %v4976_v58 = vsel %vm547_vm1, %v3245_v48, %v3246_v49 }
 0x2cb   : > { %v2108_v5 = vadd.f32 %v4938_v25, %v2094_v54  ;;  %v2095_v6 = vmul.f32 %v4045_v55, %v4928_v22  ;;  %v4981_v7 = vshrl.u32 %v4963_v52, 16  ;;  %v4984_v59 = vshll.u32 %v4963_v52, 16 }
 0x2cc   : > { %v4987_v8 = vadd.f32 %v4946_v30, %v3218_v3  ;;  %v3219_v60 = vmul.f32 %v4046_v57, %v4933_v24  ;;  %v2220_v9 = vrot.slane %v4963_v52, 1  ;;  %v2252_v15 = vrot.slane %v4963_v52, 2 }
 0x2cd   : > { %v2109_v10 = vadd.f32 %v4938_v25, %v2095_v6  ;;  %v2189_v11 = vrot.slane %v4984_v59, 1  ;;  %v2231_v13 = vrot.slane %v4981_v7, 1  ;;  %v2115_v16 = vmax.f32 %v2108_v5, 0.0  ;;  %v4433_v5 = vld [vmem:[#allocation6 + $0x80] sm:$0xff]  }
 0x2ce   : > { %v4996_v12 = vadd.f32 %v4946_v30, %v3219_v60  ;;  %v2068_v17 = vpop.f32.mrb[8].mxu1  ;;  %v2232_v18 = vrot.slane %v4984_v59, 2  ;;  %v2263_v19 = vrot.slane %v4981_v7, 2  ;;  %v3248_v20 = vrot.slane %v4987_v8, 4 }
 0x2cf   : > { %v2116_v21 = vmax.f32 %v2109_v10, 0.0  ;;  %v4047_v14 = vadd.f32 %v2068_v17, %v4913_v61  ;;  %v2070_v23 = vpop.f32.mrb[9].mxu1  ;;  %v2264_v27 = vrot.slane %v4984_v59, 3  ;;  %v2190_v32 = vor.u32 %v2189_v11, %v4981_v7 }
 0x2d0   : > { %v3250_v28 = vrot.slane %v4996_v12, 4  ;;  %v4048_v29 = vadd.f32 %v2070_v23, %v4915_v62  ;;  %v2072_v31 = vpop.f32.mrb[10].mxu1  ;;  %v2233_v33 = vor.u32 %v2232_v18, %v2231_v13  ;;  %v2293_v61 = vrot.slane %v4981_v7, 3 }
 0x2d1   : > { %v5006_v34 = vpack.c.bf16 %v2116_v21, %v2115_v16  ;;  %v2096_v35 = vmul.f32 %v4047_v14, %v4928_v22  ;;  %v4049_v36 = vadd.f32 %v2072_v31, %v4917_v63  ;;  %v2074_v37 = vpop.f32.mrb[11].mxu1  ;;  %v5013_v40 = vor.u32 %v2264_v27, %v2263_v19  ;;  %v4434_v16 = vld [vmem:[#allocation6 + $0xc8] sm:$0xff]  }
 0x2d2   : > { %v3220_v38 = vmul.f32 %v4048_v29, %v4933_v24  ;;  %v4050_v39 = vadd.f32 %v2074_v37, %v4919_v0  ;;  %v2294_v62 = vrot.slane %v4984_v59, 4  ;;  %v2282_v47 = vrot.slane %v4963_v52, 3 }
 0x2d3   : > { %v2110_v42 = vadd.f32 %v4938_v25, %v2096_v35  ;;  %v2097_v43 = vmul.f32 %v4049_v36, %v4928_v22  ;;  %v5019_v44 = vshll.u32 %v5006_v34, 16  ;;  %v5022_v63 = vshrl.u32 %v5006_v34, 16  ;;  %v4436_v36 = vld [vmem:[#allocation6 + $0xd0] sm:$0xff]  }
 0x2d4   : > { %v5025_v45 = vadd.f32 %v4946_v30, %v3220_v38  ;;  %v3221_v0 = vmul.f32 %v4050_v39, %v4933_v24  ;;  %v2221_v46 = vrot.slane %v5006_v34, 1  ;;  %v2253_v54 = vrot.slane %v5006_v34, 2 }
 0x2d5   : > { %v2111_v48 = vadd.f32 %v4938_v25, %v2097_v43  ;;  %v2194_v50 = vrot.slane %v5019_v44, 1  ;;  %v2234_v51 = vrot.slane %v5022_v63, 1  ;;  %v2117_v55 = vmax.f32 %v2110_v42, 0.0 }
 0x2d6   : > { %v5036_v56 = vadd.f32 %v4946_v30, %v3221_v0  ;;  %v2078_v3 = vpop.f32.mrb[12].mxu1  ;;  %v2235_v6 = vrot.slane %v5019_v44, 2  ;;  %v5046_v7 = vsel %vm2219_vm4, %v2220_v9, %v2221_v46  ;;  %v3252_v59 = vrot.slane %v5025_v45, 4  ;;  %v4437_v0 = vld [vmem:[#allocation6 + $0x90] sm:$0xff]   ;;  %v4447_v45 = vld [vmem:[#allocation6 + $0xb8] sm:$0xff]  }
 0x2d7   : > { %v2118_v60 = vmax.f32 %v2111_v48, 0.0  ;;  %v4051_v10 = vadd.f32 %v2078_v3, %v4921_v1  ;;  %v2080_v11 = vpop.f32.mrb[13].mxu1  ;;  %v2195_v13 = vsel %vm2183_vm3, %v2190_v32, %v2194_v50  ;;  %v2198_v18 = vor.u32 %v5022_v63, %v2194_v50 }
 0x2d8   : > { %v4052_v26 = vadd.f32 %v2080_v11, %v4923_v2  ;;  %v2082_v17 = vpop.f32.mrb[14].mxu1  ;;  %2930 = vmatprep.mubr.bf16.mxu0 %v2195_v13  ;;  %v2236_v19 = vor.u32 %v2235_v6, %v2234_v51  ;;  %v2266_v21 = vrot.slane %v5022_v63, 2  ;;  %v2267_v2 = vrot.slane %v5019_v44, 3  ;;  %v4439_v11 = vld [vmem:[#allocation6 + $0x98] sm:$0xff]  }
 0x2d9   : > { %v5054_v9 = vpack.c.bf16 %v2118_v60, %v2117_v55  ;;  %v2098_v14 = vmul.f32 %v4051_v10, %v4928_v22  ;;  %v2083_v1 = vpop.f32.mrb[15].mxu1  ;;  %3800 = vmatmul.mubr.msk.bf16.vlgmr.msra.gmra.mrb[28].mxu0 %vm5040_vm10, %v4965_v53  ;;  %v5066_v23 = vsel %vm2251_vm5, %v2252_v15, %v2253_v54  ;;  %v3254_v27 = vrot.slane %v5036_v56, 4  ;;  %v4435_v22 = vld [vmem:[#allocation6 + $0x88] sm:$0xff]   ;;  %v4438_v55 = vld [vmem:[#allocation6 + $0xd8] sm:$0xff]   ;;  %v4440_v17 = vld [vmem:[#allocation6 + $0xe0] sm:$0xff]  }
 0x2da   : > { %v3222_v29 = vmul.f32 %v4052_v26, %v4933_v24  ;;  %3881 = vmatpush3.bf16.msra.mxu0 %v4433_v5  ;;  %v5071_v31 = vsel %vm2230_vm6, %v2233_v33, %v2236_v19  ;;  %v2295_v32 = vor.u32 %v2294_v62, %v2293_v61  ;;  %v2268_v38 = vor.u32 %v2267_v2, %v2266_v21  ;;  %v4451_v56 = vld [vmem:[#allocation6 + $0x108] sm:$0xff]  }
 0x2db   : > { %v2112_v53 = vadd.f32 %v4938_v25, %v2098_v14  ;;  %3882 = vmatprep.subr.bf16.mxu0 %v4434_v16  ;;  %v2200_v35 = vshll.u32 %v5054_v9, 16  ;;  %v2204_v37 = vshrl.u32 %v5054_v9, 16  ;;  %v2223_v15 = vrot.slane %v5054_v9, 1 }
 0x2dc   : > { %v2255_v39 = vrot.slane %v5054_v9, 2  ;;  %v2296_v24 = vrot.slane %v5022_v63, 3  ;;  %v2297_v42 = vrot.slane %v5019_v44, 4  ;;  %v5081_v25 = vadd.f32 %v4946_v30, %v3222_v29 }
 0x2dd   : > { %v2119_v33 = vmax.f32 %v2112_v53, 0.0  ;;  %v2202_v43 = vrot.slane %v2200_v35, 1  ;;  %v2238_v61 = vrot.slane %v2204_v37, 1  ;;  %v2239_v62 = vrot.slane %v2200_v35, 2 }
 0x2de   : > { %3883 = vmatpush3.bf16.msra.mxu0 %v4435_v22  ;;  %v5084_v48 = vsel %vm2219_vm4, %v2221_v46, %v2223_v15  ;;  %v5088_v50 = vsel %vm2262_vm7, %v5013_v40, %v2268_v38  ;;  %v2270_v51 = vrot.slane %v2204_v37, 2  ;;  %v2271_v5 = vrot.slane %v2200_v35, 3 }
 0x2df   : > { %v2178_v44 = vsel %vm2150_vm8, %v2119_v33, 0.0  ;;  %v2203_v63 = vsel %vm2183_vm3, %v2198_v18, %v2202_v43  ;;  %3884 = vmatprep.subr.bf16.mxu0 %v4436_v36  ;;  %v2206_v3 = vor.u32 %v2204_v37, %v2202_v43  ;;  %v2240_v30 = vor.u32 %v2239_v62, %v2238_v61 }
 0x2e0   : > { %v5093_v57 = vpack.c.bf16 %v2178_v44, %v2178_v44  ;;  %2938 = vmatprep.mubr.bf16.mxu0 %v2203_v63  ;;  %v5098_v46 = vsel %vm2251_vm5, %v2253_v54, %v2255_v39  ;;  %v2298_v40 = vor.u32 %v2297_v42, %v2296_v24  ;;  %v2283_v6 = vrot.slane %v5006_v34, 3 }
 0x2e1   : > { %2939 = vmatmul.mubr.bf16.gmra.mrb[32].mxu0 %v5006_v34  ;;  %v5102_v4 = vsel %vm2230_vm6, %v2236_v19, %v2240_v30  ;;  %v2300_v60 = vrot.slane %v2204_v37, 3  ;;  %v2301_v10 = vrot.slane %v2200_v35, 4  ;;  %v2272_v54 = vor.u32 %v2271_v5, %v2270_v51 }
 0x2e2   : > { %3885 = vmatpush3.bf16.msra.mxu0 %v4437_v0  ;;  %v2208_v13 = vshll.u32 %v5093_v57, 16  ;;  %v2242_v16 = vshrl.u32 %v5093_v57, 16  ;;  %v2225_v26 = vrot.slane %v5093_v57, 1  ;;  %v2257_v18 = vrot.slane %v5093_v57, 2 }
 0x2e3   : > { %3886 = vmatprep.subr.bf16.mxu0 %v4438_v55  ;;  %v5110_v19 = vsel %vm2292_vm11, %v2295_v32, %v2298_v40  ;;  %v5115_v21 = vsel %vm2281_vm12, %v2282_v47, %v2283_v6  ;;  %v2302_v14 = vor.u32 %v2301_v10, %v2300_v60  ;;  %v5121_v53 = vsel %vm2262_vm7, %v2268_v38, %v2272_v54  ;;  %v4441_v47 = vld [vmem:[#allocation6 + $0xa0] sm:$0xff]   ;;  %v4450_v10 = vld [vmem:[#allocation6 + $0x148] sm:$0xff]  }
 0x2e4   : > { %v2210_v1 = vrot.slane %v2208_v13, 1  ;;  %v2244_v2 = vrot.slane %v2242_v16, 1  ;;  %v2245_v29 = vrot.slane %v2208_v13, 2  ;;  %v5118_v22 = vsel %vm2219_vm4, %v2223_v15, %v2225_v26  ;;  %v4442_v15 = vld [vmem:[#allocation6 + $0xe8] sm:$0xff]   ;;  %v4449_v60 = vld [vmem:[#allocation6 + $0x100] sm:$0xff]  }
 0x2e5   : > { %v2274_v35 = vrot.slane %v2242_v16, 2  ;;  %v2275_v36 = vrot.slane %v2208_v13, 3  ;;  %v5124_v32 = vsel %vm2251_vm5, %v2255_v39, %v2257_v18  ;;  %v5128_v42 = vsel %vm2292_vm11, %v2298_v40, %v2302_v14  ;;  %v4456_v26 = vld [vmem:[#allocation6 + $0x160] sm:$0xff]   ;;  %v4461_v18 = vld [vmem:[#allocation6 + $0x130] sm:$0xff]  }
 0x2e6   : > { %3887 = vmatpush3.bf16.msra.mxu0 %v4439_v11  ;;  %v2211_v37 = vsel %vm2183_vm3, %v2206_v3, %v2210_v1  ;;  %v2246_v24 = vor.u32 %v2245_v29, %v2244_v2  ;;  %v2285_v33 = vrot.slane %v5054_v9, 3  ;;  %v2304_v43 = vrot.slane %v2242_v16, 3  ;;  %v4453_v11 = vld [vmem:[#allocation6 + $0x110] sm:$0xff]   ;;  %v4455_v16 = vld [vmem:[#allocation6 + $0x118] sm:$0xff]   ;;  %v4464_v1 = vld [vmem:[#allocation6 + $0x1c0] sm:$0xff]  }
 0x2e7   : > { %2946 = vmatprep.mubr.bf16.mxu0 %v2211_v37  ;;  %3888 = vmatprep.subr.bf16.mxu0 %v4440_v17  ;;  %v2276_v38 = vor.u32 %v2275_v36, %v2274_v35  ;;  %v2305_v61 = vrot.slane %v2208_v13, 4  ;;  %v2287_v62 = vrot.slane %v5093_v57, 3  ;;  %v3256_v39 = vrot.slane %v5081_v25, 4  ;;  %v4443_v25 = vld [vmem:[#allocation6 + $0xa8] sm:$0xff]   ;;  %v4454_v13 = vld [vmem:[#allocation6 + $0x158] sm:$0xff]   ;;  %v4460_v17 = vld [vmem:[#allocation6 + $0x170] sm:$0xff]  }
 0x2e8   : > { %v2247_v0 = vsel %vm2230_vm6, %v2240_v30, %v2246_v24  ;;  %v5135_v51 = vsel %vm2281_vm12, %v2283_v6, %v2285_v33  ;;  %v2312_v44 = vrot.slane %v4963_v52, 4  ;;  %v2313_v5 = vrot.slane %v5006_v34, 4  ;;  %v4446_v6 = vld [vmem:[#allocation6 + $0xf8] sm:$0xff]   ;;  %v4465_v2 = vld [vmem:[#allocation6 + $0x180] sm:$0xff]   ;;  %v4466_v29 = vld [vmem:[#allocation6 + $0x1c8] sm:$0xff]  }
 0x2e9   : > { %2947 = vmatmul.mubr.bf16.gmra.mrb[36].mxu0 %v5054_v9  ;;  %v5140_v63 = vsel %vm2262_vm7, %v2272_v54, %v2276_v38  ;;  %v2306_v55 = vor.u32 %v2305_v61, %v2304_v43  ;;  %v5143_v3 = vsel %vm2281_vm12, %v2285_v33, %v2287_v62  ;;  %v2315_v30 = vrot.slane %v5054_v9, 4  ;;  %v4457_v54 = vld [vmem:[#allocation6 + $0x120] sm:$0xff]   ;;  %v4469_v35 = vld [vmem:[#allocation6 + $0x190] sm:$0xff]   ;;  %v4470_v36 = vld [vmem:[#allocation6 + $0x1d8] sm:$0xff]  }
 0x2ea   : > { %3889 = vmatpush3.bf16.msra.mxu0 %v4441_v47  ;;  %2987 = vmatprep.mubr.bf16.mxu0 %v5071_v31  ;;  %v2317_v40 = vrot.slane %v5093_v57, 4  ;;  %v5154_v52 = vsel %vm547_vm1, %v3246_v49, %v3248_v20  ;;  %v5161_v34 = vsel %vm547_vm1, %v3248_v20, %v3250_v28  ;;  %v4444_v31 = vld [vmem:[#allocation6 + $0xf0] sm:$0xff]   ;;  %v5167_v57 = vsel %vm547_vm1, %v2312_v44, %v2313_v5  ;;  %v4471_v37 = vld [vmem:[#allocation6 + $0x198] sm:$0xff]   ;;  %v4472_v47 = vld [vmem:[#allocation6 + $0x1e0] sm:$0xff]  }
 0x2eb   : > { %3890 = vmatprep.subr.bf16.mxu0 %v4442_v15  ;;  %v5164_v9 = vsel %vm2292_vm11, %v2302_v14, %v2306_v55  ;;  %v5174_v41 = vsel %vm547_vm1, %v3250_v28, %v3252_v59  ;;  %v5181_v49 = vsel %vm547_vm1, %v3252_v59, %v3254_v27  ;;  %v5184_v8 = vsel %vm547_vm1, %v2313_v5, %v2315_v30  ;;  %v4445_v28 = vld [vmem:[#allocation6 + $0xb0] sm:$0xff]   ;;  %v4448_v59 = vld [vmem:[#allocation6 + $0x140] sm:$0xff]   ;;  %v4463_v14 = vld [vmem:[#allocation6 + $0x138] sm:$0xff]  }
 0x2ec   : > { %v5187_v20 = vsel %vm547_vm1, %v2315_v30, %v2317_v40  ;;  %v5192_v12 = vsel %vm547_vm1, %v3254_v27, %v3256_v39  ;;  %v4452_v27 = vld [vmem:[#allocation6 + $0x150] sm:$0xff]   ;;  %v4475_v24 = vld [vmem:[#allocation6 + $0x1a8] sm:$0xff]   ;;  %v4478_v15 = vld [vmem:[#allocation6 + $0x1f8] sm:$0xff]  }
 0x2ed   : > { %v4476_v33 = vld [vmem:[#allocation6 + $0x1f0] sm:$0xff]   ;;  %v4479_v38 = vld [vmem:[#allocation6 + $0x1b8] sm:$0xff]   ;;  %v4480_v43 = vld [vmem:[#allocation6 + $0x200] sm:$0xff]  }
 0x2ee   : > { %3891 = vmatpush3.bf16.msra.mxu0 %v4443_v25  ;;  %v4488_v61 = vld [vmem:[#allocation2] sm:$0xff]  ;;  %v4483_v62 = vld [vmem:[#allocation6 + $0x218] sm:$0xff]   ;;  %v4484_v39 = vld [vmem:[#allocation6 + $0x220] sm:$0xff]  }
 0x2ef   : > { %3892 = vmatprep.subr.bf16.mxu0 %v4444_v31 }
 0x2f2   : > { %3893 = vmatpush3.bf16.msra.mxu0 %v4445_v28 }
 0x2f3   : > { %3894 = vmatprep.subr.bf16.mxu0 %v4446_v6 }
 0x2f6   : > { %3895 = vmatpush3.bf16.msra.mxu0 %v4447_v45 }
 0x2f7   : > { %3914 = vmatprep.subr.bf16.mxu0 %v4448_v59 }
 0x2f9   : > { %2988 = vmatmul.mubr.bf16.vlgmr.msra.gmra.mrb[40].mxu0 %v5046_v7  ;;  %v4458_v7 = vld [vmem:[#allocation6 + $0x168] sm:$0xff]  }
 0x2fa   : > { %2995 = vmatprep.mubr.bf16.mxu0 %v5102_v4  ;;  %3915 = vmatpush3.bf16.msra.mxu0 %v4449_v60  ;;  %v4459_v4 = vld [vmem:[#allocation6 + $0x128] sm:$0xff]  }
 0x2fb   : > { %3916 = vmatprep.subr.bf16.mxu0 %v4450_v10 }
 0x2fe   : > { %3917 = vmatpush3.bf16.msra.mxu0 %v4451_v56 }
 0x2ff   : > { %3918 = vmatprep.subr.bf16.mxu0 %v4452_v27 }
 0x301   : > { %2996 = vmatmul.mubr.bf16.gmra.mrb[44].mxu0 %v5084_v48  ;;  %v4462_v48 = vld [vmem:[#allocation6 + $0x178] sm:$0xff]  }
 0x302   : > { %3003 = vmatprep.mubr.bf16.mxu0 %v2247_v0  ;;  %3919 = vmatpush3.bf16.msra.mxu0 %v4453_v11  ;;  %v4487_v0 = vld [vmem:[#allocation6 + $0x238] sm:$0xff]  }
 0x303   : > { %3920 = vmatprep.subr.bf16.mxu0 %v4454_v13 }
 0x306   : > { %3921 = vmatpush3.bf16.msra.mxu0 %v4455_v16 }
 0x307   : > { %3922 = vmatprep.subr.bf16.mxu0 %v4456_v26 }
 0x309   : > { %3004 = vmatmul.mubr.bf16.gmra.mrb[48].mxu0 %v5118_v22  ;;  %v4468_v22 = vld [vmem:[#allocation6 + $0x1d0] sm:$0xff]  }
 0x30a   : > { %3923 = vmatpush3.bf16.msra.mxu0 %v4457_v54  ;;  %3044 = vmatprep.mubr.bf16.mxu0 %v5088_v50  ;;  %v4467_v50 = vld [vmem:[#allocation6 + $0x188] sm:$0xff]  }
 0x30b   : > { %3924 = vmatprep.subr.bf16.mxu0 %v4458_v7 }
 0x30e   : > { %3925 = vmatpush3.bf16.msra.mxu0 %v4459_v4 }
 0x30f   : > { %3926 = vmatprep.subr.bf16.mxu0 %v4460_v17 }
 0x312   : > { %3927 = vmatpush3.bf16.msra.mxu0 %v4461_v18 }
 0x313   : > { %3928 = vmatprep.subr.bf16.mxu0 %v4462_v48 }
 0x316   : > { %3929 = vmatpush3.bf16.msra.mxu0 %v4463_v14 }
 0x317   : > { %3948 = vmatprep.subr.bf16.mxu0 %v4464_v1 }
 0x319   : > { %3045 = vmatmul.mubr.bf16.vlgmr.msra.gmra.mrb[52].mxu0 %v5066_v23  ;;  %v4473_v23 = vld [vmem:[#allocation6 + $0x1a0] sm:$0xff]  }
 0x31a   : > { %3052 = vmatprep.mubr.bf16.mxu0 %v5121_v53  ;;  %3949 = vmatpush3.bf16.msra.mxu0 %v4465_v2  ;;  %v4474_v53 = vld [vmem:[#allocation6 + $0x1e8] sm:$0xff]  }
 0x31b   : > { %3950 = vmatprep.subr.bf16.mxu0 %v4466_v29 }
 0x31e   : > { %3951 = vmatpush3.bf16.msra.mxu0 %v4467_v50 }
 0x31f   : > { %3952 = vmatprep.subr.bf16.mxu0 %v4468_v22 }
 0x321   : > { %3053 = vmatmul.mubr.bf16.gmra.mrb[56].mxu0 %v5098_v46  ;;  %v4477_v46 = vld [vmem:[#allocation6 + $0x1b0] sm:$0xff]  }
 0x322   : > { %3060 = vmatprep.mubr.bf16.mxu0 %v5140_v63  ;;  %3953 = vmatpush3.bf16.msra.mxu0 %v4469_v35 }
 0x323   : > { %3954 = vmatprep.subr.bf16.mxu0 %v4470_v36 }
 0x326   : > { %3955 = vmatpush3.bf16.msra.mxu0 %v4471_v37 }
 0x327   : > { %3956 = vmatprep.subr.bf16.mxu0 %v4472_v47 }
 0x329   : > { %3061 = vmatmul.mubr.bf16.gmra.mrb[60].mxu0 %v5124_v32  ;;  %v4482_v32 = vld [vmem:[#allocation6 + $0x210] sm:$0xff]  }
 0x32a   : > { %3957 = vmatpush3.bf16.msra.mxu0 %v4473_v23  ;;  %3101 = vmatprep.mubr.bf16.mxu0 %v5110_v19  ;;  %v4481_v19 = vld [vmem:[#allocation6 + $0x208] sm:$0xff]  }
 0x32b   : > { %3958 = vmatprep.subr.bf16.mxu0 %v4474_v53 }
 0x32e   : > { %3959 = vmatpush3.bf16.msra.mxu0 %v4475_v24 }
 0x32f   : > { %3960 = vmatprep.subr.bf16.mxu0 %v4476_v33 }
 0x332   : > { %3961 = vmatpush3.bf16.msra.mxu0 %v4477_v46 }
 0x333   : > { %3962 = vmatprep.subr.bf16.mxu0 %v4478_v15 }
 0x336   : > { %3963 = vmatpush3.bf16.msra.mxu0 %v4479_v38 }
 0x337   : > { %4011 = vmatprep.subr.bf16.mxu0 %v4488_v61 }
 0x339   : > { %3102 = vmatmul.mubr.bf16.vlgmr.msra.gmra.mrb[64].mxu0 %v5115_v21  ;;  %v4485_v21 = vld [vmem:[#allocation6 + $0x228] sm:$0xff]  }
 0x33a   : > { %3109 = vmatprep.mubr.bf16.mxu0 %v5128_v42  ;;  %4012 = vmatpush3.bf16.msra.mxu0 %v4480_v43  ;;  %v4486_v42 = vld [vmem:[#allocation6 + $0x230] sm:$0xff]  }
 0x33b   : > { %4013 = vmatprep.subr.bf16.mxu0 %v4488_v61 }
 0x33e   : > { %4014 = vmatpush3.bf16.msra.mxu0 %v4481_v19 }
 0x33f   : > { %4015 = vmatprep.subr.bf16.mxu0 %v4488_v61 }
 0x341   : > { %3110 = vmatmul.mubr.bf16.gmra.mrb[68].mxu0 %v5135_v51 }
 0x342   : > { %3117 = vmatprep.mubr.bf16.mxu0 %v5164_v9  ;;  %4016 = vmatpush3.bf16.msra.mxu0 %v4482_v32 }
 0x343   : > { %4017 = vmatprep.subr.bf16.mxu0 %v4488_v61 }
 0x346   : > { %4018 = vmatpush3.bf16.msra.mxu0 %v4483_v62 }
 0x347   : > { %4019 = vmatprep.subr.bf16.mxu0 %v4488_v61 }
 0x349   : > { %3118 = vmatmul.mubr.bf16.gmra.mrb[72].mxu0 %v5143_v3 }
 0x34a   : > { %4020 = vmatpush3.bf16.msra.mxu0 %v4484_v39  ;;  %4027 = vmatprep.mubr.msk.bf16.mxu0 %vm4642_vm13, %v4488_v61 }
 0x34b   : > { %4021 = vmatprep.subr.bf16.mxu0 %v4488_v61 }
 0x34e   : > { %4022 = vmatpush3.bf16.msra.mxu0 %v4485_v21 }
 0x34f   : > { %4023 = vmatprep.subr.bf16.mxu0 %v4488_v61 }
 0x352   : > { %4024 = vmatpush3.bf16.msra.mxu0 %v4486_v42 }
 0x353   : > { %4025 = vmatprep.subr.bf16.mxu0 %v4488_v61 }
 0x356   : > { %4026 = vmatpush3.bf16.msra.mxu0 %v4487_v0 }
 0x359   : > { %4028 = vmatmul.mubr.bf16.vlgmr.msra.gmra.mrb[76].mxu0 %v5167_v57 }
 0x35a   : > { %4031 = vmatprep.mubr.msk.bf16.mxu0 %vm4642_vm13, %v4488_v61 }
 0x361   : > { %4032 = vmatmul.mubr.bf16.gmra.mrb[80].mxu0 %v5184_v8 }
 0x362   : > { %4035 = vmatprep.mubr.msk.bf16.mxu0 %vm4642_vm13, %v4488_v61 }
 0x369   : > { %4036 = vmatmul.mubr.bf16.gmra.mrb[84].mxu0 %v5187_v20 }
 0x3ac   : > { %v3862_v51 = vpop.f32.mrb[28].mxu0 }
 0x3ad   : > { %v3863_v44 = vpop.f32.mrb[29].mxu0 }
 0x3ae   : > { %v3864_v63 = vadd.f32 %v3863_v44, %v3862_v51  ;;  %v3865_v55 = vpop.f32.mrb[30].mxu0 }
 0x3af   : > { %v3866_v3 = vpop.f32.mrb[31].mxu0 }
 0x3b0   : > { %v3867_v5 = vadd.f32 %v3866_v3, %v3865_v55 }
 0x3b4   : > { %v3868_v25 = vpop.f32.mrb[32].mxu0 }
 0x3b5   : > { %v3869_v30 = vpop.f32.mrb[33].mxu0 }
 0x3b6   : > { %v3870_v40 = vadd.f32 %v3869_v30, %v3868_v25  ;;  %v3871_v31 = vpop.f32.mrb[34].mxu0 }
 0x3b7   : > { %v3872_v9 = vpop.f32.mrb[35].mxu0 }
 0x3b8   : > { %v3873_v28 = vadd.f32 %v3872_v9, %v3871_v31 }
 0x3bc   : > { %v3874_v6 = vpop.f32.mrb[36].mxu0 }
 0x3bd   : > { %v3875_v57 = vpop.f32.mrb[37].mxu0 }
 0x3be   : > { %v3876_v45 = vadd.f32 %v3875_v57, %v3874_v6  ;;  %v3877_v59 = vpop.f32.mrb[38].mxu0 }
 0x3bf   : > { %v3878_v8 = vpop.f32.mrb[39].mxu0 }
 0x3c0   : > { %v3879_v60 = vadd.f32 %v3878_v8, %v3877_v59 }
 0x3cc   : > { %v3896_v10 = vpop.f32.mrb[40].mxu0 }
 0x3cd   : > { %v3897_v20 = vpop.f32.mrb[41].mxu0 }
 0x3ce   : > { %v3898_v56 = vadd.f32 %v3897_v20, %v3896_v10  ;;  %v3899_v27 = vpop.f32.mrb[42].mxu0 }
 0x3cf   : > { %v3900_v11 = vpop.f32.mrb[43].mxu0 }
 0x3d0   : > { %v2990_v13 = vadd.f32 %v3898_v56, %v3864_v63  ;;  %v3901_v16 = vadd.f32 %v3900_v11, %v3899_v27 }
 0x3d2   : > { %v2993_v26 = vadd.f32 %v3901_v16, %v3867_v5 }
 0x3d4   : > { %v3902_v54 = vpop.f32.mrb[44].mxu0 }
 0x3d5   : > { %v3903_v7 = vpop.f32.mrb[45].mxu0 }
 0x3d6   : > { %v3904_v4 = vadd.f32 %v3903_v7, %v3902_v54  ;;  %v3905_v17 = vpop.f32.mrb[46].mxu0 }
 0x3d7   : > { %v3906_v18 = vpop.f32.mrb[47].mxu0 }
 0x3d8   : > { %v2998_v48 = vadd.f32 %v3904_v4, %v3870_v40  ;;  %v3907_v14 = vadd.f32 %v3906_v18, %v3905_v17 }
 0x3da   : > { %v3001_v1 = vadd.f32 %v3907_v14, %v3873_v28 }
 0x3dc   : > { %v3908_v2 = vpop.f32.mrb[48].mxu0 }
 0x3dd   : > { %v3909_v29 = vpop.f32.mrb[49].mxu0 }
 0x3de   : > { %v3910_v50 = vadd.f32 %v3909_v29, %v3908_v2  ;;  %v3911_v22 = vpop.f32.mrb[50].mxu0 }
 0x3df   : > { %v3912_v35 = vpop.f32.mrb[51].mxu0 }
 0x3e0   : > { %v3006_v36 = vadd.f32 %v3910_v50, %v3876_v45  ;;  %v3913_v37 = vadd.f32 %v3912_v35, %v3911_v22  ;;  %v3802_v50 = vld [vmem:[%s5293_s9] ss:$0 sm:$0xff] }
 0x3e2   : > { %v3009_v47 = vadd.f32 %v3913_v37, %v3879_v60 }
 0x3ec   : > { %v3930_v23 = vpop.f32.mrb[52].mxu0 }
 0x3ed   : > { %v3931_v53 = vpop.f32.mrb[53].mxu0 }
 0x3ee   : > { %v3932_v24 = vadd.f32 %v3931_v53, %v3930_v23  ;;  %v3933_v33 = vpop.f32.mrb[54].mxu0 }
 0x3ef   : > { %v3934_v46 = vpop.f32.mrb[55].mxu0 }
 0x3f0   : > { %v3047_v15 = vadd.f32 %v3932_v24, %v2990_v13  ;;  %v3935_v38 = vadd.f32 %v3934_v46, %v3933_v33 }
 0x3f2   : > { %v3050_v43 = vadd.f32 %v3935_v38, %v2993_v26 }
 0x3f4   : > { %v3936_v61 = vpop.f32.mrb[56].mxu0 }
 0x3f5   : > { %v3937_v19 = vpop.f32.mrb[57].mxu0 }
 0x3f6   : > { %v3938_v32 = vadd.f32 %v3937_v19, %v3936_v61  ;;  %v3939_v62 = vpop.f32.mrb[58].mxu0 }
 0x3f7   : > { %v3940_v39 = vpop.f32.mrb[59].mxu0 }
 0x3f8   : > { %v3055_v21 = vadd.f32 %v3938_v32, %v2998_v48  ;;  %v3941_v42 = vadd.f32 %v3940_v39, %v3939_v62 }
 0x3fa   : > { %v3058_v0 = vadd.f32 %v3941_v42, %v3001_v1  ;;  %v3801_v1 = vld [vmem:[%s5292_s8] ss:$0 sm:$0xff] }
 0x3fc   : > { %v3942_v51 = vpop.f32.mrb[60].mxu0 }
 0x3fd   : > { %v3943_v44 = vpop.f32.mrb[61].mxu0 }
 0x3fe   : > { %v3944_v63 = vadd.f32 %v3943_v44, %v3942_v51  ;;  %v3945_v55 = vpop.f32.mrb[62].mxu0 }
 0x3ff   : > { %v3946_v3 = vpop.f32.mrb[63].mxu0 }
 0x400   : > { %v3063_v5 = vadd.f32 %v3944_v63, %v3006_v36  ;;  %v3947_v25 = vadd.f32 %v3946_v3, %v3945_v55 }
 0x402   : > { %v3066_v30 = vadd.f32 %v3947_v25, %v3009_v47 }
 0x40c   : > { %v3964_v40 = vpop.f32.mrb[64].mxu0 }
 0x40d   : > { %v3965_v31 = vpop.f32.mrb[65].mxu0 }
 0x40e   : > { %v3966_v9 = vadd.f32 %v3965_v31, %v3964_v40  ;;  %v3967_v28 = vpop.f32.mrb[66].mxu0 }
 0x40f   : > { %v3968_v6 = vpop.f32.mrb[67].mxu0 }
 0x410   : > { %v3969_v57 = vadd.f32 %v3968_v6, %v3967_v28  ;;  %v3104_v45 = vadd.f32 %v3966_v9, %v3047_v15 }
 0x412   : > { %v3107_v59 = vadd.f32 %v3969_v57, %v3050_v43 }
 0x414   : > { %v3970_v8 = vpop.f32.mrb[68].mxu0 }
 0x415   : > { %v3971_v60 = vpop.f32.mrb[69].mxu0 }
 0x416   : > { %v3972_v10 = vadd.f32 %v3971_v60, %v3970_v8  ;;  %v3973_v20 = vpop.f32.mrb[70].mxu0 }
 0x417   : > { %v3974_v56 = vpop.f32.mrb[71].mxu0 }
 0x418   : > { %v3975_v27 = vadd.f32 %v3974_v56, %v3973_v20  ;;  %v3112_v11 = vadd.f32 %v3972_v10, %v3055_v21 }
 0x41a   : > { %v3115_v13 = vadd.f32 %v3975_v27, %v3058_v0 }
 0x41c   : > { %v3976_v16 = vpop.f32.mrb[72].mxu0 }
 0x41d   : > { %v3977_v26 = vpop.f32.mrb[73].mxu0 }
 0x41e   : > { %v3978_v54 = vadd.f32 %v3977_v26, %v3976_v16  ;;  %v3979_v7 = vpop.f32.mrb[74].mxu0 }
 0x41f   : > { %v3980_v4 = vpop.f32.mrb[75].mxu0 }
 0x420   : > { %v3981_v17 = vadd.f32 %v3980_v4, %v3979_v7  ;;  %v3120_v18 = vadd.f32 %v3978_v54, %v3063_v5 }
 0x422   : > { %v3123_v48 = vadd.f32 %v3981_v17, %v3066_v30 }
 0x42c   : > { %v3160_v14 = vpop.f32.mrb[76].mxu0 }
 0x42d   : > { %v3161_v2 = vadd.f32 %v3160_v14, %v3104_v45  ;;  %v4029_v29 = vpop.f32.mrb[77].mxu0 }
 0x42e   : > { %v3163_v22 = vpop.f32.mrb[78].mxu0 }
 0x42f   : > { %v3190_v35 = vmul.f32 %v3801_v1, %v3161_v2  ;;  %v3164_v36 = vadd.f32 %v3163_v22, %v3107_v59  ;;  %v4030_v37 = vpop.f32.mrb[79].mxu0 }
 0x431   : > { %v3203_v47 = vadd.f32 %v3802_v50, %v3190_v35  ;;  %v3191_v23 = vmul.f32 %v3801_v1, %v3164_v36 }
 0x433   : > { %v3264_v53 = vadd.f32 %v4976_v58, %v3203_v47  ;;  %v3204_v24 = vadd.f32 %v3802_v50, %v3191_v23 }
 0x434   : > { %v3168_v33 = vpop.f32.mrb[80].mxu0 }
 0x435   : > { %v3265_v46 = vadd.f32 %v5154_v52, %v3204_v24  ;;  %v3169_v15 = vadd.f32 %v3168_v33, %v3112_v11  ;;  %v4033_v38 = vpop.f32.mrb[81].mxu0  ;;  %v3270_v61 = vmax.f32 %v3264_v53, 0.0 }
 0x436   : > { %v3171_v43 = vpop.f32.mrb[82].mxu0 }
 0x437   : > { %v3271_v19 = vmax.f32 %v3265_v46, 0.0  ;;  %v3192_v32 = vmul.f32 %v3801_v1, %v3169_v15  ;;  %v3172_v62 = vadd.f32 %v3171_v43, %v3115_v13  ;;  %v4034_v39 = vpop.f32.mrb[83].mxu0 }
 0x439   : > { %v3823_v21 = vpack.c.bf16 %v3271_v19, %v3270_v61  ;;  %v3205_v42 = vadd.f32 %v3802_v50, %v3192_v32  ;;  %v3193_v0 = vmul.f32 %v3801_v1, %v3172_v62 }
 0x43b   : > { %3824 = vst [vmem:[%s450_s21] sm:$0xff] %v3823_v21   ;;  %v3266_v58 = vadd.f32 %v5161_v34, %v3205_v42  ;;  %v3206_v51 = vadd.f32 %v3802_v50, %v3193_v0 }
 0x43c   : > { %v3176_v44 = vpop.f32.mrb[84].mxu0 }
 0x43d   : > { %v3267_v52 = vadd.f32 %v5174_v41, %v3206_v51  ;;  %v3177_v63 = vadd.f32 %v3176_v44, %v3120_v18  ;;  %v4037_v55 = vpop.f32.mrb[85].mxu0  ;;  %v3272_v5 = vmax.f32 %v3266_v58, 0.0 }
 0x43e   : > { %v3179_v3 = vpop.f32.mrb[86].mxu0 }
 0x43f   : > { %v3273_v25 = vmax.f32 %v3267_v52, 0.0  ;;  %v3194_v30 = vmul.f32 %v3801_v1, %v3177_v63  ;;  %v3180_v40 = vadd.f32 %v3179_v3, %v3123_v48  ;;  %v4038_v31 = vpop.f32.mrb[87].mxu0 }
 0x441   : > { %v3828_v9 = vpack.c.bf16 %v3273_v25, %v3272_v5  ;;  %v3207_v28 = vadd.f32 %v3802_v50, %v3194_v30  ;;  %v3195_v6 = vmul.f32 %v3801_v1, %v3180_v40 }
 0x443   : > { %3835 = vst [vmem:[%s450_s21 + $0x8] sm:$0xff] %v3828_v9   ;;  %v3268_v34 = vadd.f32 %v5181_v49, %v3207_v28  ;;  %v3208_v57 = vadd.f32 %v3802_v50, %v3195_v6 }
 0x445   : > { %v3269_v41 = vadd.f32 %v5192_v12, %v3208_v57  ;;  %v3274_v45 = vmax.f32 %v3268_v34, 0.0 }
 0x447   : > { %v3275_v59 = vmax.f32 %v3269_v41, 0.0 }
 0x449   : > { %v3833_v8 = vpack.c.bf16 %v3275_v59, %v3274_v45 }
 0x44b   : > { %3836 = vst [vmem:[%s450_s21 + $0x10] sm:$0xff] %v3833_v8  }
 0x44c   : > { %4558 = shalt.err (!%p4555_p6)
}
 0x44d   : > { %s4559_s19 = scalar_lea.hbm %s5232_s17, 384  ;;  %s4563_s20 = scalar_lea.hbm %s5326_s29, 768 }
 0x44e   : > { %p4560_p7 = scmp.ne.s32.totalorder %s5232_s17, %s4559_s19  ;;  %p4564_p0 = scmp.lt.u32.totalorder %s5232_s17, %s5326_s29 }
 0x44f   : > { %p4565_p1 = scmp.lt.u32.totalorder %s4563_s20, %s4559_s19  ;;  %p4567_p13 = scmp.lt.u32.totalorder %s4559_s19, %s5232_s17 }
 0x450   : > { %p4561_p9 = pnand %p4560_p7, %p5327_p8 }
 0x451   : > { %p4566_p4 = por %p4565_p1, %p4564_p0 }
 0x452   : > { %p4562_p12 = pneg %p4561_p9 }
 0x453   : > { %p4568_p10 = por %p4567_p13, %p4566_p4 }
 0x455   : > { %p4569_p11 = pnand %p4568_p10, %p4562_p12 }
 0x457   : > { %4572 = shalt.err (!%p4569_p11)
}
 0x458   : > { %s4644_s26 = smov 64   ;;  %s4645_s28 = smov 4  }
 0x459   : > { %4113 = dma.vmem_to_hbm [thread:$0]  (%p5327_p8), %s5234_s23, 384, %s5232_s17, %s5238_s25, %s4644_s26, %s4644_s26, %s4645_s28  }
 0x45a PF: > { %s5328_s14 = sld [smem:[#allocation15_spill]]  ;;  %s5329_s24 = sld [smem:[#allocation12_spill]] }
 0x45b   : > { %s5330_s15 = sld [smem:[#allocation17_spill]] }
 0x460   : > { %p4130_p2 = scmp.ge.s32.totalorder %s5328_s14, 2  ;;  %s3337_s16 = sand.u32 1, %s5329_s24  }
 0x461   : > { %p5331_p3 = scmp.ne.s32.totalorder %s5330_s15, 0  ;;  %s3338_s27 = scalar_lea.sflag [#allocation5], %s3337_s16 }
 0x463   : > { %p4123_p5 = pnand %p4130_p2, %p5331_p3 }
 0x465   : > { %4606 = dma.done.wait (!%p4123_p5), %s3338_s27, 384  }
 0x466   : > { %4608 = vsyncadd (!%p4123_p5), %s3338_s27, 4294966912  ;;  %s27_s26 = sadd.s32 1, %s5328_s14   ;;  %s5332_s19 = sld [smem:[#allocation13_spill]] }
 0x467   : > { %p24_p6 = scmp.ge.s32.totalorder %s27_s26, 4   ;;  %s5333_s23 = sld [smem:[#allocation18_spill]] }
 0x468   : > { %s5334_s24 = sld [smem:[#allocation14_spill]]  ;;  %s5335_s25 = sld [smem:[#allocation16_spill]] }
 0x469   : > { %s5336_s21 = smov %s4615_s22  ;;  %26 = sbr.rel (!%p24_p6) target bundleno = 8 (0x8), region = 179 }
 0x46c   : > { %s5337_s22 = smov %s5332_s19 }
 0x470   :  { %3343 = vsyncpa [#allocation4], 1 }
 0x471   :  { %3345 = vsyncpa [#allocation4 + $0x1], 1 }
 0x472   :  { %3346 = vsyncpa [#allocation7], 1 }
 0x473   :  { %3347 = vsyncpa [#allocation5], 1 }
 0x474   :  { %3349 = vsyncpa [#allocation5 + $0x1], 1 }

</bundles_post_ra>
